<compile_context>
chip_gen: v7x
topology: tpu7x:2x2x1
jax: 0.10.0
libtpu: 0.0.40
codegen_flags: <defaults>
</compile_context>

<pallas_src>
import functools

import jax
import jax.numpy as jnp
from jax.experimental import pallas as pl
from jax.experimental.pallas import tpu as pltpu


def _round_up(v: int, m: int) -> int:
    return ((v + m - 1) // m) * m


def _round_down(v: int, m: int) -> int:
    return (v // m) * m


# --------------------------------------------------------------------------- #
# Kernel
# --------------------------------------------------------------------------- #
def _implicit_linear_kernel(x_ref, u_ref, m1_ref, m2_ref, ct_ref, dx_ref, y_ref):
    # dx = x @ M1 + u @ M2   (inv(E).T already folded into M1/M2)
    # y  = x @ Ct
    # Two independent MXU matmuls feeding dx (no chained dependency through the
    # MXU result path), plus one small matmul for y.  All accumulate in f32.
    x = x_ref[...]
    dx = jnp.dot(x, m1_ref[...], preferred_element_type=jnp.float32)
    dx = dx + jnp.dot(u_ref[...], m2_ref[...], preferred_element_type=jnp.float32)
    dx_ref[...] = dx.astype(dx_ref.dtype)
    y_ref[...] = jnp.dot(
        x, ct_ref[...], preferred_element_type=jnp.float32
    ).astype(y_ref.dtype)


# --------------------------------------------------------------------------- #
# Weight folding (hoistable / cacheable precompute)
# --------------------------------------------------------------------------- #
def fold_implicit_weights(E, F_w, B_w, C_w, compute_dtype=jnp.float32):
    """Fold inv(E) into the weights once (solve, not explicit inverse).

    M1 = F_w.T @ Einv.T = solve(E, F_w).T   (nx, nx)
    M2 = B_w.T @ Einv.T = solve(E, B_w).T   (nu, nx)
    Ct = C_w.T                              (nx, ny)

    Folding is done in f32 regardless of compute_dtype; only the folded
    matrices are cast (an ill-conditioned E would otherwise amplify bf16
    rounding).  Cache the result when E/F/B/C are static.
    """
    # TODO(synk): the dense (nx,nx) solve has no clean Pallas TPU primitive; it
    # is a tiny one-off precompute done in plain JAX (LU solve).
    Ef = E.astype(jnp.float32)
    M1 = jnp.linalg.solve(Ef, F_w.astype(jnp.float32)).T
    M2 = jnp.linalg.solve(Ef, B_w.astype(jnp.float32)).T
    Ct = C_w.astype(jnp.float32).T
    return (M1.astype(compute_dtype), M2.astype(compute_dtype), Ct.astype(compute_dtype))


# --------------------------------------------------------------------------- #
# Tile selection
# --------------------------------------------------------------------------- #
def _choose_batch_tile(batch, nx, nu, ny, in_itemsize, out_itemsize,
                       tb_max, vmem_budget_bytes, min_grid_steps):
    # Sublane granularity: 8 rows for 32-bit, 16 for 16-bit dtypes.
    row_mult = 8 if in_itemsize >= 4 else 16
    # Double-buffered activations + outputs, single-buffered resident weights.
    weight_bytes = (nx * nx + nu * nx + nx * ny) * in_itemsize
    per_row_bytes = 2 * ((nx + nu) * in_itemsize + (nx + ny) * out_itemsize)
    tb_vmem = max(row_mult, (vmem_budget_bytes - weight_bytes) // per_row_bytes)
    # Force >= min_grid_steps grid steps so the "parallel" batch axis can shard
    # across v7x's two TensorCores (no-op cost on v5e/v6e at these tile sizes).
    tb_mc = _round_up(pl.cdiv(batch, min_grid_steps), row_mult)
    tb = min(tb_max, tb_vmem, tb_mc)
    tb = max(row_mult, _round_down(tb, row_mult))
    if tb >= batch:
        tb = batch  # single step; block == full array is always a legal shape
    return tb


def _resident_weight_spec(shape):
    """Grid-resident weight: constant index_map; request single buffering so the
    pipeline does not allocate a pointless second buffer for unchanging data."""
    idx = lambda i: (0, 0)
    buffered = getattr(pl, "Buffered", None)
    if buffered is not None:
        try:
            return pl.BlockSpec(shape, idx, pipeline_mode=buffered(buffer_count=1))
        except TypeError:
            pass  # older JAX without pipeline_mode: fall back to default buffering
    return pl.BlockSpec(shape, idx)


# --------------------------------------------------------------------------- #
# Wrappers
# --------------------------------------------------------------------------- #
def implicit_nn_linear_apply(u, x, M1, M2, Ct, *,
                             out_dtype=None,
                             tb_max=8192,
                             vmem_budget_bytes=40 * 1024 * 1024,
                             vmem_limit_bytes=48 * 1024 * 1024,
                             min_grid_steps=4):
    """Run the kernel given already-folded weights (M1, M2, Ct).

    u: (batch, nu), x: (batch, nx), M1: (nx, nx), M2: (nu, nx), Ct: (nx, ny).
    Returns (dx, y). Compute dtype = M1.dtype; output dtype defaults to it
    (halves output HBM traffic when bf16) -- cast back in the caller if needed.
    """
    batch, nx = x.shape
    _, nu = u.shape
    ny = Ct.shape[1]

    compute_dtype = M1.dtype
    if out_dtype is None:
        out_dtype = compute_dtype
    xk = x.astype(compute_dtype)
    uk = u.astype(compute_dtype)

    in_itemsize = jnp.dtype(compute_dtype).itemsize
    out_itemsize = jnp.dtype(out_dtype).itemsize
    tb = _choose_batch_tile(batch, nx, nu, ny, in_itemsize, out_itemsize,
                            tb_max, vmem_budget_bytes, min_grid_steps)
    grid = (pl.cdiv(batch, tb),)

    cost = pl.CostEstimate(
        flops=int(2 * batch * nx * (nx + nu + ny)),
        transcendentals=0,
        bytes_accessed=int(
            (batch * (nx + nu) + nx * nx + nu * nx + nx * ny) * in_itemsize
            + batch * (nx + ny) * out_itemsize),
    )

    dx, y = pl.pallas_call(
        _implicit_linear_kernel,
        out_shape=(jax.ShapeDtypeStruct((batch, nx), out_dtype),
                   jax.ShapeDtypeStruct((batch, ny), out_dtype)),
        grid=grid,
        in_specs=[
            pl.BlockSpec((tb, nx), lambda i: (i, 0)),   # x  (pipelined over batch)
            pl.BlockSpec((tb, nu), lambda i: (i, 0)),   # u  (pipelined over batch)
            _resident_weight_spec((nx, nx)),            # M1 (resident)
            _resident_weight_spec((nu, nx)),            # M2 (resident)
            _resident_weight_spec((nx, ny)),            # Ct (resident)
        ],
        out_specs=(
            pl.BlockSpec((tb, nx), lambda i: (i, 0)),   # dx (no lane padding)
            pl.BlockSpec((tb, ny), lambda i: (i, 0)),   # y  (no lane padding)
        ),
        compiler_params=pltpu.CompilerParams(
            dimension_semantics=("parallel",),
            vmem_limit_bytes=vmem_limit_bytes),
        cost_estimate=cost,
    )(xk, uk, M1, M2, Ct)
    return dx, y


def implicit_nn_linear_forward(u, x, E, F_w, B_w, C_w, *,
                               compute_dtype=None, out_dtype=None, **kwargs):
    """Convenience one-shot forward (folds weights every call).

    Matches the PyTorch module: returns (dx, y).  When E/F/B/C are static,
    prefer fold_implicit_weights(...) once + implicit_nn_linear_apply(...).
    For HBM-bound production on v5e/v6e/v7x pass compute_dtype=jnp.bfloat16.
    """
    if compute_dtype is None:
        compute_dtype = x.dtype
    M1, M2, Ct = fold_implicit_weights(E, F_w, B_w, C_w, compute_dtype)
    return implicit_nn_linear_apply(u, x, M1, M2, Ct, out_dtype=out_dtype, **kwargs)


# --------------------------------------------------------------------------- #
# Self-test
# --------------------------------------------------------------------------- #
if __name__ == "__main__":
    batch, nu, nx, ny = 8, 16, 32, 8
    key = jax.random.PRNGKey(0)
    k_u, k_x, k_E, k_F, k_B, k_C = jax.random.split(key, 6)

    u = jax.random.normal(k_u, (batch, nu), dtype=jnp.float32)
    x = jax.random.normal(k_x, (batch, nx), dtype=jnp.float32)

    # Parameter init mirrors __init__: E ~ randn(nx, nx); F/B/C are Linear weights.
    E = jax.random.normal(k_E, (nx, nx), dtype=jnp.float32)
    F_w = jax.random.normal(k_F, (nx, nx), dtype=jnp.float32) * 0.1
    B_w = jax.random.normal(k_B, (nx, nu), dtype=jnp.float32) * 0.1
    C_w = jax.random.normal(k_C, (ny, nx), dtype=jnp.float32) * 0.1

    # Pure-JAX reference (same math as the PyTorch module).
    Einv = jnp.linalg.inv(E)
    dx_ref = (x @ F_w.T + u @ B_w.T) @ Einv.T
    y_ref = x @ C_w.T

    # ---- f32 path (strict check), via the one-shot wrapper ----
    dx, y = jax.jit(implicit_nn_linear_forward)(u, x, E, F_w, B_w, C_w)
    jax.block_until_ready((dx, y))
    assert dx.shape == (batch, nx) and y.shape == (batch, ny)
    assert jnp.allclose(dx, dx_ref, atol=1e-4, rtol=1e-4)
    assert jnp.allclose(y, y_ref, atol=1e-5, rtol=1e-5)

    # ---- bf16 path (production default on bandwidth-bound v5e/v6e/v7x) ----
    # Weight folding hoisted out of the per-call path; f32 folding, bf16 cast.
    fold_bf16 = jax.jit(functools.partial(fold_implicit_weights,
                                          compute_dtype=jnp.bfloat16))
    M1b, M2b, Ctb = fold_bf16(E, F_w, B_w, C_w)
    dx_b, y_b = jax.jit(implicit_nn_linear_apply)(u, x, M1b, M2b, Ctb)
    jax.block_until_ready((dx_b, y_b))
    rel = lambda a, b: float(jnp.linalg.norm(a.astype(jnp.float32) - b)
                             / (jnp.linalg.norm(b) + 1e-6))
    assert dx_b.shape == (batch, nx) and y_b.shape == (batch, ny)
    assert rel(dx_b, dx_ref) < 5e-2
    assert rel(y_b, y_ref) < 5e-2

    print("KERNEL_OK")
</pallas_src>

<mosaic_0001>
module attributes {stable_mosaic.version = 11 : i64} {
  func.func @_implicit_linear_kernel(%arg0: i32, %arg1: memref<8x32xf32, #tpu.memory_space<vmem>>, %arg2: memref<8x16xf32, #tpu.memory_space<vmem>>, %arg3: memref<32x32xf32, #tpu.memory_space<vmem>>, %arg4: memref<16x32xf32, #tpu.memory_space<vmem>>, %arg5: memref<32x8xf32, #tpu.memory_space<vmem>>, %arg6: memref<8x32xf32, #tpu.memory_space<vmem>>, %arg7: memref<8x8xf32, #tpu.memory_space<vmem>>) attributes {dimension_semantics = [#tpu.dimension_semantics<parallel>], iteration_bounds = array<i64: 1>, scalar_prefetch = 0 : i64, scratch_operands = 0 : i64, tpu.core_type = #tpu.core_type<tc>, window_params = [{transform_indices = @transform_0, window_bounds = array<i64: 8, 32>}, {transform_indices = @transform_1, window_bounds = array<i64: 8, 16>}, {pipeline_mode = #tpu.pipeline_mode<synchronous>, transform_indices = @transform_2, window_bounds = array<i64: 32, 32>}, {pipeline_mode = #tpu.pipeline_mode<synchronous>, transform_indices = @transform_3, window_bounds = array<i64: 16, 32>}, {pipeline_mode = #tpu.pipeline_mode<synchronous>, transform_indices = @transform_4, window_bounds = array<i64: 32, 8>}, {transform_indices = @transform_5, window_bounds = array<i64: 8, 32>}, {transform_indices = @transform_6, window_bounds = array<i64: 8, 8>}]} {
    %c0 = arith.constant 0 : index
    %c0_0 = arith.constant 0 : index
    %0 = vector.load %arg1[%c0, %c0_0] : memref<8x32xf32, #tpu.memory_space<vmem>>, vector<8x32xf32>
    %c0_1 = arith.constant 0 : index
    %c0_2 = arith.constant 0 : index
    %1 = vector.load %arg3[%c0_1, %c0_2] : memref<32x32xf32, #tpu.memory_space<vmem>>, vector<32x32xf32>
    %cst = arith.constant dense<0.000000e+00> : vector<8x32xf32>
    %2 = tpu.matmul %0, %1, %cst {dimension_numbers = #tpu.dot_dimension_numbers<[1], [0], [0], [1], [0, 0, 1, 1], [], []>} : vector<8x32xf32>, vector<32x32xf32>, vector<8x32xf32> -> vector<8x32xf32>
    %c0_3 = arith.constant 0 : index
    %c0_4 = arith.constant 0 : index
    %3 = vector.load %arg2[%c0_3, %c0_4] : memref<8x16xf32, #tpu.memory_space<vmem>>, vector<8x16xf32>
    %c0_5 = arith.constant 0 : index
    %c0_6 = arith.constant 0 : index
    %4 = vector.load %arg4[%c0_5, %c0_6] : memref<16x32xf32, #tpu.memory_space<vmem>>, vector<16x32xf32>
    %cst_7 = arith.constant dense<0.000000e+00> : vector<8x32xf32>
    %5 = tpu.matmul %3, %4, %cst_7 {dimension_numbers = #tpu.dot_dimension_numbers<[1], [0], [0], [1], [0, 0, 1, 1], [], []>} : vector<8x16xf32>, vector<16x32xf32>, vector<8x32xf32> -> vector<8x32xf32>
    %6 = arith.addf %2, %5 : vector<8x32xf32>
    %c0_8 = arith.constant 0 : index
    %c0_9 = arith.constant 0 : index
    %7 = vector.load %arg6[%c0_8, %c0_9] : memref<8x32xf32, #tpu.memory_space<vmem>>, vector<8x32xf32>
    tpu.vector_store %arg6[%c0_8, %c0_9], %6 {strides = array<i32>} : memref<8x32xf32, #tpu.memory_space<vmem>>, vector<8x32xf32>,
    %c0_10 = arith.constant 0 : index
    %c0_11 = arith.constant 0 : index
    %8 = vector.load %arg5[%c0_10, %c0_11] : memref<32x8xf32, #tpu.memory_space<vmem>>, vector<32x8xf32>
    %cst_12 = arith.constant dense<0.000000e+00> : vector<8x8xf32>
    %9 = tpu.matmul %0, %8, %cst_12 {dimension_numbers = #tpu.dot_dimension_numbers<[1], [0], [0], [1], [0, 0, 1, 1], [], []>} : vector<8x32xf32>, vector<32x8xf32>, vector<8x8xf32> -> vector<8x8xf32>
    %c0_13 = arith.constant 0 : index
    %c0_14 = arith.constant 0 : index
    %10 = vector.load %arg7[%c0_13, %c0_14] : memref<8x8xf32, #tpu.memory_space<vmem>>, vector<8x8xf32>
    tpu.vector_store %arg7[%c0_13, %c0_14], %9 {strides = array<i32>} : memref<8x8xf32, #tpu.memory_space<vmem>>, vector<8x8xf32>,
    return
  }
  func.func @transform_0(%arg0: i32) -> (i32, i32) {
    %c0_i32 = arith.constant 0 : i32
    %c0_i32_0 = arith.constant 0 : i32
    return %arg0, %c0_i32 : i32, i32
  }
  func.func @transform_1(%arg0: i32) -> (i32, i32) {
    %c0_i32 = arith.constant 0 : i32
    %c0_i32_0 = arith.constant 0 : i32
    return %arg0, %c0_i32 : i32, i32
  }
  func.func @transform_2(%arg0: i32) -> (i32, i32) {
    %c0_i32 = arith.constant 0 : i32
    %c0_i32_0 = arith.constant 0 : i32
    %c0_i32_1 = arith.constant 0 : i32
    return %c0_i32, %c0_i32_0 : i32, i32
  }
  func.func @transform_3(%arg0: i32) -> (i32, i32) {
    %c0_i32 = arith.constant 0 : i32
    %c0_i32_0 = arith.constant 0 : i32
    %c0_i32_1 = arith.constant 0 : i32
    return %c0_i32, %c0_i32_0 : i32, i32
  }
  func.func @transform_4(%arg0: i32) -> (i32, i32) {
    %c0_i32 = arith.constant 0 : i32
    %c0_i32_0 = arith.constant 0 : i32
    %c0_i32_1 = arith.constant 0 : i32
    return %c0_i32, %c0_i32_0 : i32, i32
  }
  func.func @transform_5(%arg0: i32) -> (i32, i32) {
    %c0_i32 = arith.constant 0 : i32
    %c0_i32_0 = arith.constant 0 : i32
    return %arg0, %c0_i32 : i32, i32
  }
  func.func @transform_6(%arg0: i32) -> (i32, i32) {
    %c0_i32 = arith.constant 0 : i32
    %c0_i32_0 = arith.constant 0 : i32
    return %arg0, %c0_i32 : i32, i32
  }
}

</mosaic_0001>

<bundles_post_ra>
// kernel: custom-call.17
= control target key start
LH: loop header
LB: loop body
LE: loop exit
PB: predicated region body
PF: predicated region fallthrough
CT: control target
= control target key end

     0   :  { %5 = vsyncpa [#allocation1], 0  ;;  %s839_s0 = inlined_call_operand.hbm [shape: f32[32,32], index: 0, kind: input, shape index: {}]   ;;  %s840_s1 = inlined_call_operand.vmem [shape: f32[32,32], index: 1, kind: output, shape index: {0}]   ;;  %s841_s2 = inlined_call_operand.hbm [shape: s32[32], index: 2, kind: output, shape index: {1}]   ;;  %s842_s3 = inlined_call_operand.vmem [shape: s32[32], index: 3, kind: output, shape index: {2}]  }
   0x1   :  { %6 = vsyncpa [#allocation2], 0  ;;  %s695_s12 = smov [#allocation0]   ;;  %s595_s16 = scalar_lea.hbm %s839_s0, 512 }
   0x2   :  { %s10_s13 = sshll.u32 %s695_s12, 4  ;;  %p596_p0 = scmp.ne.s32.totalorder %s839_s0, %s595_s16  ;;  %s11_s13 = int_to_ptr.vmem [resolvable:$true] %s10_s13 }
   0x3   :  { %p599_p1 = scmp.lt.u32.totalorder %s595_s16, %s839_s0 }
   0x5   :  { %p601_p2 = pnand %p599_p1, %p596_p0 }
   0x7   :  { %604 = shalt.err (!%p601_p2)
}
   0x8   :  { %s605_s21 = scalar_lea.vmem %s11_s13, 512  ;;  %p610_p4 = scmp.lt.s32.totalorder %s11_s13, %s11_s13 }
   0x9   :  { %p606_p3 = scmp.ne.s32.totalorder %s11_s13, %s605_s21  ;;  %p611_p5 = scmp.lt.s32.totalorder %s605_s21, %s605_s21 }
   0xb   :  { %p612_p6 = por %p611_p5, %p610_p4 }
   0xd   :  { %p613_p7 = pnand %p612_p6, %p606_p3 }
   0xf   :  { %616 = shalt.err (!%p613_p7)
}
  0x10   :  { %13 = dma.hbm_to_vmem [thread:$0]  %s839_s0, 512, %s11_s13, [#allocation1]  }
  0x11   :  { %675 = dma.done.wait [#allocation1], 512  }
  0x12   :  { %676 = vsyncadd [#allocation1], 4294966784  ;;  %v30_v0 = vlaneseq  ;;  %v696_v1 = vmov 0   ;;  %v15_v3 = vld [vmem:[#allocation0] sm:$0xff]  ;;  %v19_v4 = vld [vmem:[#allocation0 + $0x8] sm:$0xff]  ;;  %s679_s24 = smov 0  }
  0x13   :  { %29 = vst [vmem:[#allocation4] sm:$0x1] %v696_v1  ;;  %v23_v5 = vld [vmem:[#allocation0 + $0x10] sm:$0xff]  ;;  %16 = vst [vmem:[#allocation3] sm:$0xff] %v15_v3  ;;  %v27_v6 = vld [vmem:[#allocation0 + $0x18] sm:$0xff] }
  0x14   :  { %v731_v2 = vshrl.u32 %v30_v0, 7  ;;  %20 = vst [vmem:[#allocation3 + $0x8] sm:$0xff] %v19_v4  ;;  %24 = vst [vmem:[#allocation3 + $0x10] sm:$0xff] %v23_v5 }
  0x15   :  { %28 = vst [vmem:[#allocation3 + $0x18] sm:$0xff] %v27_v6 }
  0x16 LB: > { %s499_s0 = sshll.u32 %s681_s24, 3  ;;  %s38_s24 = sadd.s32 1, %s681_s24   ;;  %s681_s24 = sphi %s679_s24, %s38_s24  }
  0x17   : > { %v42_v7 = vstv %s499_s0  ;;  %s40_s25 = scalar_lea.vmem [#allocation8], %s499_s0  ;;  %p35_p8 = scmp.ge.s32.totalorder %s38_s24, 4  }
  0x18   : > { %v43_v8 = vadd.s32 %v42_v7, %v731_v2  ;;  %s734_s26 = smov (%p35_p8), 0  }
  0x19   :  { %37 = sbr.rel (!%p35_p8) target bundleno = 22 (0x16), region = 131 }
  0x1a   : > { %44 = vst [vmem:[%s40_s25] sm:$0xff] %v43_v8 }
  0x20 LB: > { %v55_v9 = vld [vmem:[#allocation3] sm:$0xff]  ;;  %v67_v10 = vld [vmem:[#allocation3 + $0x8] sm:$0xff]  ;;  %v740_v11 = vadd.s32 8, %v731_v2  ;;  %v743_v13 = vstv %s685_s26  ;;  %v79_v15 = vld [vmem:[#allocation3 + $0x10] sm:$0xff]  ;;  %v748_v16 = vadd.s32 16, %v731_v2  ;;  %v755_v21 = vadd.s32 24, %v731_v2  ;;  %s685_s26 = sphi %s734_s26, %s50_s26  }
  0x21   : > { %v56_v12 = vand.u32 2147483647, %v55_v9  ;;  %v68_v14 = vand.u32 2147483647, %v67_v10  ;;  %vm59_vm0 = vcmp.ge.s32.totalorder %v731_v2, %v743_v13  ;;  %v80_v19 = vand.u32 2147483647, %v79_v15 }
  0x22   : > { %vm71_vm3 = vcmp.ge.s32.totalorder %v740_v11, %v743_v13  ;;  %v91_v20 = vld [vmem:[#allocation3 + $0x18] sm:$0xff]  ;;  %vm83_vm6 = vcmp.ge.s32.totalorder %v748_v16, %v743_v13  ;;  %vm95_vm9 = vcmp.ge.s32.totalorder %v755_v21, %v743_v13  ;;  %s137_s27 = ssub.s32 128, %s685_s26  ;;  %v143_v57 = vand.u32 127, %v30_v0  ;;  %v146_v59 = vld [vmem:[#allocation4] ss:$0 sm:$0xff]  ;;  %s149_s28 = scalar_lea.vmem [#allocation3], %s685_s26 }
  0x23   : > { %vm501_vm1 = vcmp.gt.f32.partialorder %v56_v12, -inf  ;;  %v92_v24 = vand.u32 2147483647, %v91_v20  ;;  %v151_v60 = vld [vmem:[%s149_s28] ss:$0 sm:$0xff]  ;;  %s155_s30 = scalar_lea.vmem [#allocation8], %s685_s26 }
  0x24   : > { %vm63_vm2 = vmand %vm59_vm0, %vm501_vm1  ;;  %v157_v61 = vld [vmem:[%s155_s30] ss:$0 sm:$0xff]  ;;  %s50_s26 = sadd.s32 1, %s685_s26  }
  0x25   : > { %v64_v17 = vsel %vm63_vm2, %v731_v2, %v743_v13  ;;  %v65_v18 = vsel %vm63_vm2, %v56_v12, -inf  ;;  %p47_p9 = scmp.ge.s32.totalorder %s50_s26, 32  }
  0x26   : > { %vm74_vm4 = vcmp.lt.f32.partialorder %v65_v18, %v68_v14  ;;  %s687_s8 = smov (%p47_p9), %s840_s1   ;;  %s691_s9 = smov (%p47_p9), [#allocation3]  }
  0x27   : > { %vm75_vm5 = vmand %vm71_vm3, %vm74_vm4  ;;  %vm767_vm3 = vcmp.eq.s32.totalorder %v143_v57, %v743_v13 }
  0x28   : > { %v76_v22 = vsel %vm75_vm5, %v740_v11, %v64_v17  ;;  %v77_v23 = vsel %vm75_vm5, %v68_v14, %v65_v18  ;;  %vm190_vm5 = vcmp.gt.s32.totalorder %v740_v11, %v743_v13 }
  0x29   : > { %vm86_vm7 = vcmp.lt.f32.partialorder %v77_v23, %v80_v19 }
  0x2a   : > { %vm87_vm8 = vmand %vm83_vm6, %vm86_vm7  ;;  %vm175_vm6 = vcmp.gt.s32.totalorder %v731_v2, %v743_v13  ;;  %vm205_vm7 = vcmp.gt.s32.totalorder %v748_v16, %v743_v13 }
  0x2b   : > { %v88_v25 = vsel %vm87_vm8, %v748_v16, %v76_v22  ;;  %v89_v26 = vsel %vm87_vm8, %v80_v19, %v77_v23 }
  0x2c   : > { %vm98_vm10 = vcmp.lt.f32.partialorder %v89_v26, %v92_v24 }
  0x2d   : > { %vm99_vm11 = vmand %vm95_vm9, %vm98_vm10  ;;  %vm220_vm9 = vcmp.gt.s32.totalorder %v755_v21, %v743_v13 }
  0x2e   : > { %v100_v27 = vsel %vm99_vm11, %v755_v21, %v88_v25  ;;  %v101_v28 = vsel %vm99_vm11, %v92_v24, %v89_v26  ;;  %vm194_vm10 = vmand %vm190_vm5, %vm767_vm3 }
  0x2f   : > { %v102_v29 = vrot.slane %v101_v28, 1  ;;  %v103_v30 = vrot.slane %v100_v27, 1  ;;  %vm179_vm11 = vmand %vm175_vm6, %vm767_vm3 }
  0x31   : > { %vm104_vm12 = vcmp.ge.f32.partialorder %v102_v29, %v101_v28  ;;  %v107_v31 = vrot.slane %v102_v29, 1  ;;  %v108_v32 = vrot.slane %v103_v30, 1 }
  0x32   : > { %v105_v33 = vsel %vm104_vm12, %v102_v29, %v101_v28  ;;  %v106_v34 = vsel %vm104_vm12, %v103_v30, %v100_v27  ;;  %vm209_vm12 = vmand %vm205_vm7, %vm767_vm3 }
  0x33   : > { %vm109_vm13 = vcmp.ge.f32.partialorder %v107_v31, %v105_v33  ;;  %v112_v35 = vrot.slane %v107_v31, 1  ;;  %v113_v36 = vrot.slane %v108_v32, 1 }
  0x34   : > { %v110_v37 = vsel %vm109_vm13, %v107_v31, %v105_v33  ;;  %v111_v38 = vsel %vm109_vm13, %v108_v32, %v106_v34  ;;  %vm224_vm13 = vmand %vm220_vm9, %vm767_vm3 }
  0x35   : > { %vm114_vm14 = vcmp.ge.f32.partialorder %v112_v35, %v110_v37  ;;  %v117_v39 = vrot.slane %v112_v35, 1  ;;  %v118_v40 = vrot.slane %v113_v36, 1 }
  0x36   : > { %v115_v41 = vsel %vm114_vm14, %v112_v35, %v110_v37  ;;  %v116_v42 = vsel %vm114_vm14, %v113_v36, %v111_v38  ;;  %vm167_vm14 = vcmp.gt.s32.totalorder %v143_v57, %v743_v13 }
  0x37   : > { %vm119_vm15 = vcmp.ge.f32.partialorder %v117_v39, %v115_v41  ;;  %v122_v43 = vrot.slane %v117_v39, 1  ;;  %v123_v44 = vrot.slane %v118_v40, 1 }
  0x38   : > { %v120_v45 = vsel %vm119_vm15, %v117_v39, %v115_v41  ;;  %v121_v46 = vsel %vm119_vm15, %v118_v40, %v116_v42 }
  0x39   : > { %vm124_vm0 = vcmp.ge.f32.partialorder %v122_v43, %v120_v45  ;;  %v127_v47 = vrot.slane %v122_v43, 1  ;;  %v128_v48 = vrot.slane %v123_v44, 1 }
  0x3a   : > { %v125_v49 = vsel %vm124_vm0, %v122_v43, %v120_v45  ;;  %v126_v50 = vsel %vm124_vm0, %v123_v44, %v121_v46 }
  0x3b   : > { %vm129_vm1 = vcmp.ge.f32.partialorder %v127_v47, %v125_v49  ;;  %v132_v51 = vrot.slane %v127_v47, 1  ;;  %v133_v52 = vrot.slane %v128_v48, 1 }
  0x3c   : > { %v130_v53 = vsel %vm129_vm1, %v127_v47, %v125_v49  ;;  %v131_v54 = vsel %vm129_vm1, %v128_v48, %v126_v50 }
  0x3d   : > { %vm134_vm2 = vcmp.ge.f32.partialorder %v132_v51, %v130_v53 }
  0x3e   : > { %v136_v55 = vsel %vm134_vm2, %v133_v52, %v131_v54 }
  0x3f   : > { %138 = vrot.lane.b32.xlu0 %v136_v55, %s137_s27 }
  0xb1   : > { %v139_v56 = vpop.permute.xlu0 %138 }
  0xb2   : > { %509 = vpush %v139_v56 }
  0xe3   : > { %s510_s29 = spop %509 }
  0xe4   : > { %v145_v62 = vstv %s510_s29  ;;  %s150_s4 = scalar_lea.vmem [#allocation3], %s510_s29  ;;  %s156_s5 = scalar_lea.vmem [#allocation8], %s510_s29 }
  0xe5   : > { %v147_v63 = vsel %vm767_vm3, %v145_v62, %v146_v59  ;;  %v152_v1 = vld [vmem:[%s150_s4] ss:$0 sm:$0xff] }
  0xe6   : > { %v158_v3 = vld [vmem:[%s156_s5] ss:$0 sm:$0xff]  ;;  %148 = vst [vmem:[#allocation4] sm:$0x1] %v147_v63  ;;  %153 = vst [vmem:[%s150_s4] sm:$0x1] %v151_v60  ;;  %vm161_vm4 = vcmp.ne.f32.partialorder %v152_v1, 0.0 }
  0xe7   : > { %159 = vst [vmem:[%s156_s5] sm:$0x1] %v157_v61  ;;  %154 = vst [vmem:[%s149_s28] sm:$0x1] %v152_v1  ;;  %v168_v28 = vsel %vm167_vm14, %v152_v1, 0.0 }
  0xe8   : > { %160 = vst [vmem:[%s155_s30] sm:$0x1] %v158_v3  ;;  %vm162_vm8 = vmand %vm767_vm3, %vm161_vm4 }
  0xe9   : > { %v163_v4 = vsel %vm162_vm8, %v152_v1, 1.0 }
  0xea   : > { %v191_v5 = vsel %vm190_vm5, %v163_v4, 1.0  ;;  %v176_v6 = vsel %vm175_vm6, %v163_v4, 1.0  ;;  %v206_v7 = vsel %vm205_vm7, %v163_v4, 1.0  ;;  %v221_v8 = vsel %vm220_vm9, %v163_v4, 1.0 }
  0xeb   : > { %587 = vrcp.f32 %v191_v5 }
  0xec   : > { %589 = vrcp.f32 %v176_v6 }
  0xed   : > { %591 = vrcp.f32 %v206_v7  ;;  %v286_v41 = vld [vmem:[#allocation4] sm:$0x1] (%p47_p9) }
  0xee   : > { %593 = vrcp.f32 %v221_v8  ;;  %v187_v10 = vld [vmem:[#allocation3 + $0x8] sm:$0xff]  ;;  %v172_v15 = vld [vmem:[#allocation3] sm:$0xff]  ;;  %v202_v19 = vld [vmem:[#allocation3 + $0x10] sm:$0xff]  ;;  %288 = vst [vmem:[#allocation5] sm:$0x1] (%p47_p9), %v286_v41 }
  0xef   : > { %v217_v11 = vld [vmem:[#allocation3 + $0x18] sm:$0xff]  ;;  %v235_v40 = vld [vmem:[#allocation8 + $0x10] sm:$0xff] (%p47_p9)  ;;  %v237_v42 = vld [vmem:[#allocation8 + $0x18] sm:$0xff] (%p47_p9) }
  0xf0   :  { %v231_v13 = vld [vmem:[#allocation8] sm:$0xff] (%p47_p9)  ;;  %v233_v39 = vld [vmem:[#allocation8 + $0x8] sm:$0xff] (%p47_p9) }
  0xf5   : > { %v588_v9 = vpop.eup %587 }
  0xf6   : > { %v590_v12 = vpop.eup %589  ;;  %v193_v14 = vmul.f32 %v588_v9, %v187_v10 }
  0xf7   : > { %v592_v17 = vpop.eup %591  ;;  %v178_v18 = vmul.f32 %v590_v12, %v172_v15 }
  0xf8   : > { %v195_v20 = vsel %vm194_vm10, %v193_v14, 0.0  ;;  %v208_v22 = vmul.f32 %v592_v17, %v202_v19  ;;  %v594_v23 = vpop.eup %593 }
  0xf9   : > { %196 = vadd.xlane.f32.xlu1 %v195_v20  ;;  %v180_v24 = vsel %vm179_vm11, %v178_v18, 0.0  ;;  %v223_v26 = vmul.f32 %v594_v23, %v217_v11 }
  0xfa   : > { %181 = vadd.xlane.f32.xlu0 %v180_v24  ;;  %v210_v25 = vsel %vm209_vm12, %v208_v22, 0.0 }
  0xfb   : > { %v225_v27 = vsel %vm224_vm13, %v223_v26, 0.0 }
  0xfd   : > { %211 = vadd.xlane.f32.xlu1 %v210_v25 }
 0x101   : > { %226 = vadd.xlane.f32.xlu1 %v225_v27 }
 0x127   :  { %250 = vxpose.xlu0.b32.start [1/4] (short) (narrow) (%p47_p9), %v231_v13, 8 }
 0x12b   :  { %251 = vxpose.xlu0.b32.cont [2/4] (short) (narrow) (%p47_p9), %v233_v39, 8 }
 0x12f   :  { %252 = vxpose.xlu0.b32.cont [3/4] (short) (narrow) (%p47_p9), %v235_v40, 8 }
 0x133   :  { %253 = vxpose.xlu0.b32.end [4/4] (short) (narrow) (%p47_p9), %v237_v42, 8 }
 0x186   : > { %v197_v29 = vpop.xlane.xlu1 %196 }
 0x187   : > { %v198_v30 = vmul.f32 %v197_v29, %v168_v28  ;;  %v182_v16 = vpop.xlane.xlu0 %181 }
 0x188   : > { %v183_v31 = vmul.f32 %v182_v16, %v168_v28 }
 0x189   : > { %v199_v32 = vsub.f32 %v193_v14, %v198_v30 }
 0x18a   : > { %v184_v33 = vsub.f32 %v178_v18, %v183_v31  ;;  %v212_v34 = vpop.xlane.xlu1 %211 }
 0x18b   : > { %200 = vst [vmem:[#allocation3 + $0x8] sm:$0xff] %v199_v32  ;;  %v213_v35 = vmul.f32 %v212_v34, %v168_v28 }
 0x18c   : > { %185 = vst [vmem:[#allocation3] sm:$0xff] %v184_v33 }
 0x18d   : > { %v214_v36 = vsub.f32 %v208_v22, %v213_v35 }
 0x18e   : > { %v227_v37 = vpop.xlane.xlu1 %226 }
 0x18f   : > { %215 = vst [vmem:[#allocation3 + $0x10] sm:$0xff] %v214_v36  ;;  %v228_v21 = vmul.f32 %v227_v37, %v168_v28 }
 0x191   : > { %v229_v38 = vsub.f32 %v223_v26, %v228_v21  ;;  %49 = sbr.rel (!%p47_p9) target bundleno = 32 (0x20), region = 142 }
 0x193   : > { %230 = vst [vmem:[#allocation3 + $0x18] sm:$0xff] %v229_v38 }
 0x1a7   :  { %v266_v43 = vpop.trf.xlu0 }
 0x1a8   :  { %282 = vst [vmem:[#allocation6] sm:$0x1] %v266_v43 }
 0x1af   :  { %v292_v44 = vld [vmem:[#allocation6] sm:$0x1] }
 0x1b0   :  { %294 = vst [vmem:[#allocation7] sm:$0x1] %v292_v44 }
 0x1b1 LB: > { %v342_v0 = vld [vmem:[%s693_s9] sm:$0xff]  ;;  %s344_s9 = scalar_lea.vmem %s693_s9, 8   ;;  %s693_s9 = sphi %s691_s9, %s344_s9   ;;  %s689_s8 = sphi %s687_s8, %s345_s8  }
 0x1b2   : > { %343 = vst [vmem:[%s689_s8] sm:$0xff] %v342_v0  ;;  %s345_s8 = scalar_lea.vmem %s689_s8, 8   ;;  %p339_p10 = scmp.gt.s32.totalorder %s344_s9, [#allocation3 + $0x18] }
 0x1b3   :  { %s697_s10 = smov (%p339_p10), [#allocation5]  }
 0x1b4   :  { %341 = sbr.rel (!%p339_p10) target bundleno = 433 (0x1b1), region = 164  ;;  %s362_s11 = sshll.u32 (%p339_p10), %s697_s10, 4  ;;  %s363_s11 = int_to_ptr.vmem [resolvable:$true] %s362_s11 }
 0x1b5   :  { %s617_s1 = scalar_lea.vmem (%p339_p10), %s363_s11, 16  ;;  %s621_s14 = scalar_lea.vmem (%p339_p10), %s363_s11, 32 }
 0x1b6   :  { %p618_p11 = scmp.ne.s32.totalorder (%p339_p10), %s363_s11, %s617_s1  ;;  %p622_p12 = scmp.lt.s32.totalorder (%p339_p10), %s363_s11, %s363_s11 }
 0x1b7   :  { %v428_v2 = vld [vmem:[#allocation7] sm:$0x1] (%p339_p10)  ;;  %p623_p13 = scmp.lt.s32.totalorder (%p339_p10), %s621_s14, %s617_s1 }
 0x1b8   :  { %429 = vst [vmem:[%s842_s3] sm:$0x1] (%p339_p10), %v428_v2 }
 0x1b9   :  { %p624_p0 = por (%p339_p10), %p623_p13, %p622_p12 }
 0x1bb   :  { %p625_p1 = pnand %p624_p0, %p618_p11 }
 0x1bd   :  { %628 = shalt.err (!%p625_p1)
}
 0x1be   :  { %s629_s17 = scalar_lea.hbm %s841_s2, 16 }
 0x1bf   :  { %p630_p2 = scmp.ne.s32.totalorder %s841_s2, %s629_s17  ;;  %p633_p3 = scmp.lt.u32.totalorder %s629_s17, %s841_s2 }
 0x1c1   :  { %p635_p4 = pnand %p633_p3, %p630_p2 }
 0x1c3   :  { %638 = shalt.err (!%p635_p4)
}
 0x1c4   :  { %365 = dma.vmem_to_hbm [thread:$0]  %s363_s11, 16, %s841_s2, [#allocation2]  }
 0x1c5   :  { %677 = dma.done.wait [#allocation2], 16  }
 0x1c6   :  { %678 = vsyncadd [#allocation2], 4294967280 }
 0x1c7   :  { %435 = vsyncpa [#allocation1], 1 }
 0x1c8   :  { %436 = vsyncpa [#allocation2], 1 }

// kernel: custom-call.14
= control target key start
LH: loop header
LB: loop body
LE: loop exit
PB: predicated region body
PF: predicated region fallthrough
CT: control target
= control target key end

     0   :  { %v46_v0 = vlaneseq  ;;  %v730_v9 = vmov -1.0   ;;  %v731_v53 = vmov 0.0   ;;  %s884_s0 = inlined_call_operand.vmem [shape: f32[1,32,32], index: 0, kind: input, shape index: {}]   ;;  %s885_s1 = inlined_call_operand.vmem [shape: f32[1,32,32], index: 1, kind: output, shape index: {}]  }
   0x1   :  { %v35_v1 = vld [vmem:[%s884_s0] sm:$0xff]  ;;  %v37_v36 = vld [vmem:[%s884_s0 + $0x8] sm:$0xff] }
   0x2   :  { %v745_v2 = vand.u32 127, %v46_v0  ;;  %v747_v3 = vshrl.u32 %v46_v0, 7 }
   0x4   :  { %vm52_vm0 = vcmp.eq.s32.totalorder %v747_v3, %v745_v2  ;;  %vm48_vm1 = vcmp.lt.s32.totalorder %v745_v2, 32  ;;  %vm57_vm2 = vcmp.ge.s32.totalorder %v747_v3, %v745_v2  ;;  %vm119_vm4 = vcmp.eq.s32.totalorder %v745_v2, 0 }
   0x5   :  { %v54_v4 = vsel %vm52_vm0, %v35_v1, 0.0  ;;  %vm58_vm3 = vmand %vm57_vm2, %vm48_vm1  ;;  %vm116_vm5 = vcmp.eq.s32.totalorder %v745_v2, %v747_v3  ;;  %v120_v10 = vsel %vm119_vm4, 1.0, %v730_v9  ;;  %vm148_vm6 = vcmp.eq.s32.totalorder %v745_v2, 1 }
   0x6   :  { %55 = vadd.xlane.f32.xlu0 %v54_v4  ;;  %v59_v6 = vsel %vm58_vm3, %v35_v1, 0.0  ;;  %v121_v11 = vsel %vm116_vm5, %v120_v10, 0.0  ;;  %vm158_vm7 = vcmp.eq.s32.totalorder %v745_v2, 2  ;;  %vm168_vm8 = vcmp.eq.s32.totalorder %v745_v2, 3 }
   0x7   :  { %vm178_vm9 = vcmp.eq.s32.totalorder %v745_v2, 4  ;;  %v67_v31 = vadd.s32 8, %v747_v3  ;;  %vm188_vm11 = vcmp.eq.s32.totalorder %v745_v2, 5  ;;  %vm198_vm14 = vcmp.eq.s32.totalorder %v745_v2, 6 }
   0x8   :  { %vm208_vm0 = vcmp.eq.s32.totalorder %v745_v2, 7  ;;  %vm218_vm2 = vcmp.eq.s32.totalorder %v745_v2, 8  ;;  %vm232_vm3 = vcmp.eq.s32.totalorder %v745_v2, 9  ;;  %vm246_vm4 = vcmp.eq.s32.totalorder %v745_v2, 10 }
   0x9   :  { %vm68_vm10 = vcmp.eq.s32.totalorder %v67_v31, %v745_v2  ;;  %vm73_vm12 = vcmp.ge.s32.totalorder %v67_v31, %v745_v2  ;;  %vm127_vm15 = vcmp.eq.s32.totalorder %v745_v2, %v67_v31  ;;  %vm260_vm5 = vcmp.eq.s32.totalorder %v745_v2, 11 }
   0xa   :  { %v70_v37 = vsel %vm68_vm10, %v37_v36, 0.0  ;;  %vm74_vm13 = vmand %vm73_vm12, %vm48_vm1  ;;  %v128_v54 = vsel %vm127_vm15, -1.0, %v731_v53  ;;  %vm316_vm12 = vcmp.eq.s32.totalorder %v745_v2, 15  ;;  %vm348_vm15 = vcmp.eq.s32.totalorder %v745_v2, 17 }
   0xb   :  { %v75_v44 = vsel %vm74_vm13, %v37_v36, 0.0 }
  0x93   :  { %v751_v5 = vpop.xlane.xlu0 %55 }
  0x94   :  { %722 = vrcp.f32 %v751_v5 }
  0x9e   :  { %v759_v7 = vpop.eup %722 }
  0x9f   :  { %v61_v8 = vmul.f32 %v759_v7, %v59_v6 }
  0xa1   :  { %62 = vst [vmem:[#allocation2] sm:$0xff] %v61_v8 }
  0xa8   :  { %v144_v12 = vld [vmem:[#allocation2 + $0x1] ss:$0 sm:$0xff]  ;;  %v154_v15 = vld [vmem:[#allocation2 + $0x2] ss:$0 sm:$0xff]  ;;  %v164_v20 = vld [vmem:[#allocation2 + $0x3] ss:$0 sm:$0xff] }
  0xa9   :  { %v145_v13 = vxor.u32 2147483648, %v144_v12  ;;  %v155_v17 = vxor.u32 2147483648, %v154_v15  ;;  %v165_v22 = vxor.u32 2147483648, %v164_v20  ;;  %v174_v25 = vld [vmem:[#allocation2 + $0x4] ss:$0 sm:$0xff] }
  0xaa   :  { %v175_v27 = vxor.u32 2147483648, %v174_v25  ;;  %v184_v30 = vld [vmem:[#allocation2 + $0x5] ss:$0 sm:$0xff]  ;;  %v194_v38 = vld [vmem:[#allocation2 + $0x6] ss:$0 sm:$0xff] }
  0xab   :  { %v149_v14 = vmul.f32 %v145_v13, %v121_v11  ;;  %v185_v33 = vxor.u32 2147483648, %v184_v30  ;;  %v195_v40 = vxor.u32 2147483648, %v194_v38  ;;  %v204_v47 = vld [vmem:[#allocation2 + $0x7] ss:$0 sm:$0xff] }
  0xac   :  { %v205_v50 = vxor.u32 2147483648, %v204_v47  ;;  %v83_v47 = vadd.s32 16, %v747_v3 }
  0xad   :  { %150 = vadd.xlane.f32.xlu0 %v149_v14 }
  0xae   :  { %vm89_vm10 = vcmp.ge.s32.totalorder %v83_v47, %v745_v2  ;;  %vm134_vm13 = vcmp.eq.s32.totalorder %v745_v2, %v83_v47 }
 0x13a   :  { %v151_v16 = vpop.xlane.xlu0 %150 }
 0x13b   :  { %v152_v18 = vsel %vm148_vm6, %v151_v16, %v121_v11  ;;  %vm274_vm6 = vcmp.eq.s32.totalorder %v745_v2, 12 }
 0x13c   :  { %v159_v19 = vmul.f32 %v155_v17, %v152_v18 }
 0x13e   :  { %160 = vadd.xlane.f32.xlu1 %v159_v19 }
 0x1cb   :  { %v161_v21 = vpop.xlane.xlu1 %160 }
 0x1cc   :  { %v162_v23 = vsel %vm158_vm7, %v161_v21, %v152_v18  ;;  %vm288_vm7 = vcmp.eq.s32.totalorder %v745_v2, 13 }
 0x1cd   :  { %v169_v24 = vmul.f32 %v165_v22, %v162_v23 }
 0x1cf   :  { %170 = vadd.xlane.f32.xlu1 %v169_v24 }
 0x25c   :  { %v171_v26 = vpop.xlane.xlu1 %170 }
 0x25d   :  { %v172_v28 = vsel %vm168_vm8, %v171_v26, %v162_v23  ;;  %vm84_vm8 = vcmp.eq.s32.totalorder %v83_v47, %v745_v2 }
 0x25e   :  { %v179_v29 = vmul.f32 %v175_v27, %v172_v28 }
 0x260   :  { %180 = vadd.xlane.f32.xlu0 %v179_v29 }
 0x2ed   :  { %v181_v32 = vpop.xlane.xlu0 %180 }
 0x2ee   :  { %v182_v34 = vsel %vm178_vm9, %v181_v32, %v172_v28  ;;  %vm302_vm9 = vcmp.eq.s32.totalorder %v745_v2, 14 }
 0x2ef   :  { %v189_v35 = vmul.f32 %v185_v33, %v182_v34 }
 0x2f1   :  { %190 = vadd.xlane.f32.xlu1 %v189_v35 }
 0x2f5   :  { %71 = vadd.xlane.f32.xlu1 %v70_v37 }
 0x37e   :  { %v191_v39 = vpop.xlane.xlu1 %190 }
 0x37f   :  { %v192_v41 = vsel %vm188_vm11, %v191_v39, %v182_v34  ;;  %vm90_vm11 = vmand %vm89_vm10, %vm48_vm1  ;;  %vm474_vm10 = vcmp.eq.s32.totalorder %v745_v2, 24 }
 0x380   :  { %v199_v42 = vmul.f32 %v195_v40, %v192_v41 }
 0x382   :  { %200 = vadd.xlane.f32.xlu0 %v199_v42  ;;  %v775_v43 = vpop.xlane.xlu1 %71 }
 0x383   :  { %724 = vrcp.f32 %v775_v43 }
 0x38d   :  { %v781_v45 = vpop.eup %724 }
 0x38e   :  { %v77_v46 = vmul.f32 %v781_v45, %v75_v44 }
 0x390   :  { %78 = vst [vmem:[#allocation2 + $0x8] sm:$0xff] %v77_v46 }
 0x397   :  { %v214_v48 = vld [vmem:[#allocation2 + $0x8] ss:$0 sm:$0xff]  ;;  %v228_v59 = vld [vmem:[#allocation2 + $0x9] ss:$0 sm:$0xff]  ;;  %v242_v6 = vld [vmem:[#allocation2 + $0xa] ss:$0 sm:$0xff] }
 0x398   :  { %v215_v51 = vxor.u32 2147483648, %v214_v48  ;;  %v229_v62 = vxor.u32 2147483648, %v228_v59  ;;  %v243_v10 = vxor.u32 2147483648, %v242_v6  ;;  %v256_v15 = vld [vmem:[#allocation2 + $0xb] ss:$0 sm:$0xff] }
 0x399   :  { %v257_v18 = vxor.u32 2147483648, %v256_v15  ;;  %v270_v23 = vld [vmem:[#allocation2 + $0xc] ss:$0 sm:$0xff]  ;;  %v284_v31 = vld [vmem:[#allocation2 + $0xd] ss:$0 sm:$0xff] }
 0x39a   :  { %v223_v56 = vmul.f32 %v215_v51, %v128_v54  ;;  %v271_v26 = vxor.u32 2147483648, %v270_v23  ;;  %v285_v34 = vxor.u32 2147483648, %v284_v31  ;;  %v298_v39 = vld [vmem:[#allocation2 + $0xe] ss:$0 sm:$0xff] }
 0x39b   :  { %v299_v42 = vxor.u32 2147483648, %v298_v39 }
 0x40f   :  { %v201_v49 = vpop.xlane.xlu0 %200 }
 0x410   :  { %v202_v52 = vsel %vm198_vm14, %v201_v49, %v192_v41  ;;  %vm330_vm14 = vcmp.eq.s32.totalorder %v745_v2, 16 }
 0x411   :  { %v209_v55 = vmul.f32 %v205_v50, %v202_v52 }
 0x413   :  { %210 = vadd.xlane.f32.xlu0 %v209_v55  ;;  %v312_v55 = vld [vmem:[#allocation2 + $0xf] ss:$0 sm:$0xff] }
 0x417   :  { %224 = vadd.xlane.f32.xlu0 %v223_v56 }
 0x4a0   :  { %v211_v57 = vpop.xlane.xlu0 %210 }
 0x4a1   :  { %v212_v58 = vsel %vm208_vm0, %v211_v57, %v202_v52  ;;  %v313_v57 = vxor.u32 2147483648, %v312_v55  ;;  %vm366_vm0 = vcmp.eq.s32.totalorder %v745_v2, 18 }
 0x4a2   :  { %v219_v60 = vmul.f32 %v215_v51, %v212_v58  ;;  %v39_v51 = vld [vmem:[%s884_s0 + $0x10] sm:$0xff] }
 0x4a4   :  { %v225_v61 = vpop.xlane.xlu0 %224  ;;  %220 = vadd.xlane.f32.xlu1 %v219_v60 }
 0x4a5   :  { %v226_v63 = vsel %vm218_vm2, %v225_v61, %v128_v54  ;;  %v86_v54 = vsel %vm84_vm8, %v39_v51, 0.0 }
 0x4a6   :  { %v237_v0 = vmul.f32 %v229_v62, %v226_v63 }
 0x4a8   :  { %238 = vadd.xlane.f32.xlu0 %v237_v0 }
 0x531   :  { %v221_v1 = vpop.xlane.xlu1 %220 }
 0x532   :  { %v222_v4 = vsel %vm218_vm2, %v221_v1, %v212_v58  ;;  %vm384_vm2 = vcmp.eq.s32.totalorder %v745_v2, 19 }
 0x533   :  { %v233_v8 = vmul.f32 %v229_v62, %v222_v4 }
 0x535   :  { %v239_v9 = vpop.xlane.xlu0 %238  ;;  %234 = vadd.xlane.f32.xlu1 %v233_v8 }
 0x536   :  { %v240_v11 = vsel %vm232_vm3, %v239_v9, %v226_v63  ;;  %v91_v63 = vsel %vm90_vm11, %v39_v51, 0.0  ;;  %vm496_vm11 = vcmp.eq.s32.totalorder %v745_v2, 25 }
 0x537   :  { %v251_v12 = vmul.f32 %v243_v10, %v240_v11 }
 0x539   :  { %252 = vadd.xlane.f32.xlu0 %v251_v12 }
 0x5c2   :  { %v235_v13 = vpop.xlane.xlu1 %234 }
 0x5c3   :  { %v236_v14 = vsel %vm232_vm3, %v235_v13, %v222_v4  ;;  %vm402_vm3 = vcmp.eq.s32.totalorder %v745_v2, 20 }
 0x5c4   :  { %v247_v16 = vmul.f32 %v243_v10, %v236_v14 }
 0x5c6   :  { %v253_v17 = vpop.xlane.xlu0 %252  ;;  %248 = vadd.xlane.f32.xlu1 %v247_v16 }
 0x5c7   :  { %v254_v19 = vsel %vm246_vm4, %v253_v17, %v240_v11 }
 0x5c8   :  { %v265_v20 = vmul.f32 %v257_v18, %v254_v19 }
 0x5ca   :  { %266 = vadd.xlane.f32.xlu0 %v265_v20 }
 0x653   :  { %v249_v21 = vpop.xlane.xlu1 %248 }
 0x654   :  { %v250_v22 = vsel %vm246_vm4, %v249_v21, %v236_v14  ;;  %v135_v14 = vsel %vm134_vm13, -1.0, %v731_v53  ;;  %vm420_vm4 = vcmp.eq.s32.totalorder %v745_v2, 21  ;;  %vm540_vm13 = vcmp.eq.s32.totalorder %v745_v2, 27 }
 0x655   :  { %v261_v24 = vmul.f32 %v257_v18, %v250_v22 }
 0x657   :  { %v267_v25 = vpop.xlane.xlu0 %266  ;;  %262 = vadd.xlane.f32.xlu1 %v261_v24 }
 0x658   :  { %v268_v27 = vsel %vm260_vm5, %v267_v25, %v254_v19 }
 0x659   :  { %v279_v28 = vmul.f32 %v271_v26, %v268_v27 }
 0x65b   :  { %280 = vadd.xlane.f32.xlu0 %v279_v28 }
 0x6e4   :  { %v263_v29 = vpop.xlane.xlu1 %262 }
 0x6e5   :  { %v264_v30 = vsel %vm260_vm5, %v263_v29, %v250_v22 }
 0x6e6   :  { %v275_v32 = vmul.f32 %v271_v26, %v264_v30 }
 0x6e8   :  { %v281_v33 = vpop.xlane.xlu0 %280  ;;  %276 = vadd.xlane.f32.xlu1 %v275_v32 }
 0x6e9   :  { %v282_v35 = vsel %vm274_vm6, %v281_v33, %v268_v27 }
 0x6ea   :  { %v293_v36 = vmul.f32 %v285_v34, %v282_v35 }
 0x6ec   :  { %294 = vadd.xlane.f32.xlu0 %v293_v36 }
 0x775   :  { %v277_v37 = vpop.xlane.xlu1 %276 }
 0x776   :  { %v278_v38 = vsel %vm274_vm6, %v277_v37, %v264_v30  ;;  %vm438_vm6 = vcmp.eq.s32.totalorder %v745_v2, 22 }
 0x777   :  { %v289_v40 = vmul.f32 %v285_v34, %v278_v38 }
 0x779   :  { %v295_v41 = vpop.xlane.xlu0 %294  ;;  %290 = vadd.xlane.f32.xlu1 %v289_v40 }
 0x77a   :  { %v296_v44 = vsel %vm288_vm7, %v295_v41, %v282_v35 }
 0x77b   :  { %v307_v46 = vmul.f32 %v299_v42, %v296_v44 }
 0x77d   :  { %308 = vadd.xlane.f32.xlu0 %v307_v46 }
 0x806   :  { %v291_v48 = vpop.xlane.xlu1 %290 }
 0x807   :  { %v292_v49 = vsel %vm288_vm7, %v291_v48, %v278_v38 }
 0x808   :  { %v303_v50 = vmul.f32 %v299_v42, %v292_v49 }
 0x80a   :  { %v309_v52 = vpop.xlane.xlu0 %308  ;;  %304 = vadd.xlane.f32.xlu1 %v303_v50 }
 0x80b   :  { %v310_v56 = vsel %vm302_vm9, %v309_v52, %v296_v44 }
 0x80c   :  { %v321_v58 = vmul.f32 %v313_v57, %v310_v56 }
 0x80e   :  { %87 = vadd.xlane.f32.xlu1 %v86_v54 }
 0x812   :  { %322 = vadd.xlane.f32.xlu1 %v321_v58 }
 0x897   :  { %v305_v59 = vpop.xlane.xlu1 %304 }
 0x898   :  { %v306_v60 = vsel %vm302_vm9, %v305_v59, %v292_v49 }
 0x899   :  { %v317_v61 = vmul.f32 %v313_v57, %v306_v60 }
 0x89b   :  { %318 = vadd.xlane.f32.xlu0 %v317_v61  ;;  %v800_v62 = vpop.xlane.xlu1 %87 }
 0x89c   :  { %726 = vrcp.f32 %v800_v62 }
 0x89f   :  { %v323_v4 = vpop.xlane.xlu1 %322 }
 0x8a0   :  { %v324_v9 = vsel %vm316_vm12, %v323_v4, %v310_v56 }
 0x8a6   :  { %v806_v0 = vpop.eup %726 }
 0x8a7   :  { %v93_v1 = vmul.f32 %v806_v0, %v91_v63 }
 0x8a9   :  { %94 = vst [vmem:[#allocation2 + $0x10] sm:$0xff] %v93_v1 }
 0x8b0   :  { %v326_v6 = vld [vmem:[#allocation2 + $0x10] ss:$0 sm:$0xff]  ;;  %v344_v16 = vld [vmem:[#allocation2 + $0x11] ss:$0 sm:$0xff]  ;;  %v362_v27 = vld [vmem:[#allocation2 + $0x12] ss:$0 sm:$0xff] }
 0x8b1   :  { %v327_v8 = vxor.u32 2147483648, %v326_v6  ;;  %v345_v18 = vxor.u32 2147483648, %v344_v16  ;;  %v363_v29 = vxor.u32 2147483648, %v362_v27  ;;  %v380_v38 = vld [vmem:[#allocation2 + $0x13] ss:$0 sm:$0xff] }
 0x8b2   :  { %v381_v40 = vxor.u32 2147483648, %v380_v38  ;;  %v398_v51 = vld [vmem:[#allocation2 + $0x14] ss:$0 sm:$0xff]  ;;  %v416_v1 = vld [vmem:[#allocation2 + $0x15] ss:$0 sm:$0xff] }
 0x8b3   :  { %v335_v10 = vmul.f32 %v327_v8, %v324_v9  ;;  %v339_v15 = vmul.f32 %v327_v8, %v135_v14  ;;  %v399_v54 = vxor.u32 2147483648, %v398_v51  ;;  %v417_v6 = vxor.u32 2147483648, %v416_v1  ;;  %v434_v16 = vld [vmem:[#allocation2 + $0x16] ss:$0 sm:$0xff] }
 0x8b5   :  { %336 = vadd.xlane.f32.xlu1 %v335_v10 }
 0x928   :  { %v319_v11 = vpop.xlane.xlu0 %318 }
 0x929   :  { %v320_v12 = vsel %vm316_vm12, %v319_v11, %v306_v60  ;;  %vm518_vm12 = vcmp.eq.s32.totalorder %v745_v2, 26 }
 0x92a   :  { %v331_v13 = vmul.f32 %v327_v8, %v320_v12 }
 0x92c   :  { %332 = vadd.xlane.f32.xlu0 %v331_v13 }
 0x930   :  { %340 = vadd.xlane.f32.xlu0 %v339_v15 }
 0x942   :  { %v337_v17 = vpop.xlane.xlu1 %336 }
 0x943   :  { %v338_v19 = vsel %vm330_vm14, %v337_v17, %v324_v9  ;;  %v99_v17 = vadd.s32 24, %v747_v3 }
 0x944   :  { %v353_v20 = vmul.f32 %v345_v18, %v338_v19 }
 0x945   :  { %vm100_vm5 = vcmp.eq.s32.totalorder %v99_v17, %v745_v2  ;;  %vm105_vm7 = vcmp.ge.s32.totalorder %v99_v17, %v745_v2  ;;  %vm141_vm9 = vcmp.eq.s32.totalorder %v745_v2, %v99_v17 }
 0x946   :  { %354 = vadd.xlane.f32.xlu0 %v353_v20  ;;  %vm106_vm8 = vmand %vm105_vm7, %vm48_vm1  ;;  %vm456_vm1 = vcmp.eq.s32.totalorder %v745_v2, 23 }
 0x9b9   :  { %v333_v21 = vpop.xlane.xlu0 %332 }
 0x9ba   :  { %v334_v22 = vsel %vm330_vm14, %v333_v21, %v320_v12 }
 0x9bb   :  { %v349_v23 = vmul.f32 %v345_v18, %v334_v22 }
 0x9bd   :  { %v341_v24 = vpop.xlane.xlu0 %340  ;;  %350 = vadd.xlane.f32.xlu1 %v349_v23 }
 0x9be   :  { %v342_v25 = vsel %vm330_vm14, %v341_v24, %v135_v14  ;;  %vm562_vm14 = vcmp.eq.s32.totalorder %v745_v2, 28 }
 0x9bf   :  { %v357_v26 = vmul.f32 %v345_v18, %v342_v25 }
 0x9c1   :  { %358 = vadd.xlane.f32.xlu1 %v357_v26 }
 0x9d3   :  { %v355_v28 = vpop.xlane.xlu0 %354 }
 0x9d4   :  { %v356_v30 = vsel %vm348_vm15, %v355_v28, %v338_v19  ;;  %v435_v19 = vxor.u32 2147483648, %v434_v16 }
 0x9d5   :  { %v371_v31 = vmul.f32 %v363_v29, %v356_v30 }
 0x9d7   :  { %372 = vadd.xlane.f32.xlu1 %v371_v31 }
 0xa4a   :  { %v351_v32 = vpop.xlane.xlu1 %350 }
 0xa4b   :  { %v352_v33 = vsel %vm348_vm15, %v351_v32, %v334_v22  ;;  %v41_v22 = vld [vmem:[%s884_s0 + $0x18] sm:$0xff] }
 0xa4c   :  { %v367_v34 = vmul.f32 %v363_v29, %v352_v33  ;;  %v102_v23 = vsel %vm100_vm5, %v41_v22, 0.0  ;;  %vm647_vm5 = vweird.f32 %v751_v5 }
 0xa4e   :  { %368 = vadd.xlane.f32.xlu0 %v367_v34  ;;  %v359_v35 = vpop.xlane.xlu1 %358 }
 0xa4f   :  { %v360_v36 = vsel %vm348_vm15, %v359_v35, %v342_v25  ;;  %v107_v35 = vsel %vm106_vm8, %v41_v22, 0.0  ;;  %vm584_vm15 = vcmp.eq.s32.totalorder %v745_v2, 29 }
 0xa50   :  { %v375_v37 = vmul.f32 %v363_v29, %v360_v36  ;;  %v452_v29 = vld [vmem:[#allocation2 + $0x17] ss:$0 sm:$0xff] }
 0xa51   :  { %v453_v31 = vxor.u32 2147483648, %v452_v29 }
 0xa52   :  { %376 = vadd.xlane.f32.xlu0 %v375_v37 }
 0xa64   :  { %v373_v39 = vpop.xlane.xlu1 %372 }
 0xa65   :  { %v374_v41 = vsel %vm366_vm0, %v373_v39, %v356_v30 }
 0xa66   :  { %v389_v42 = vmul.f32 %v381_v40, %v374_v41 }
 0xa68   :  { %390 = vadd.xlane.f32.xlu0 %v389_v42 }
 0xadb   :  { %v369_v44 = vpop.xlane.xlu0 %368 }
 0xadc   :  { %v370_v46 = vsel %vm366_vm0, %v369_v44, %v352_v33 }
 0xadd   :  { %v385_v47 = vmul.f32 %v381_v40, %v370_v46 }
 0xadf   :  { %386 = vadd.xlane.f32.xlu1 %v385_v47  ;;  %v377_v48 = vpop.xlane.xlu0 %376 }
 0xae0   :  { %v378_v49 = vsel %vm366_vm0, %v377_v48, %v360_v36  ;;  %vm606_vm0 = vcmp.eq.s32.totalorder %v745_v2, 30 }
 0xae1   :  { %v393_v50 = vmul.f32 %v381_v40, %v378_v49 }
 0xae3   :  { %394 = vadd.xlane.f32.xlu1 %v393_v50  ;;  %v142_v50 = vsel %vm141_vm9, -1.0, %v731_v53 }
 0xaf5   :  { %v391_v52 = vpop.xlane.xlu0 %390 }
 0xaf6   :  { %v392_v55 = vsel %vm384_vm2, %v391_v52, %v374_v41 }
 0xaf7   :  { %v407_v56 = vmul.f32 %v399_v54, %v392_v55 }
 0xaf9   :  { %408 = vadd.xlane.f32.xlu1 %v407_v56 }
 0xb6c   :  { %v387_v57 = vpop.xlane.xlu1 %386 }
 0xb6d   :  { %v388_v58 = vsel %vm384_vm2, %v387_v57, %v370_v46 }
 0xb6e   :  { %v403_v59 = vmul.f32 %v399_v54, %v388_v58 }
 0xb70   :  { %404 = vadd.xlane.f32.xlu0 %v403_v59  ;;  %v395_v60 = vpop.xlane.xlu1 %394 }
 0xb71   :  { %v396_v61 = vsel %vm384_vm2, %v395_v60, %v378_v49  ;;  %vm628_vm2 = vcmp.eq.s32.totalorder %v745_v2, 31 }
 0xb72   :  { %v411_v63 = vmul.f32 %v399_v54, %v396_v61 }
 0xb74   :  { %412 = vadd.xlane.f32.xlu0 %v411_v63 }
 0xb86   :  { %v409_v4 = vpop.xlane.xlu1 %408 }
 0xb87   :  { %v410_v8 = vsel %vm402_vm3, %v409_v4, %v392_v55 }
 0xb88   :  { %v425_v9 = vmul.f32 %v417_v6, %v410_v8 }
 0xb8a   :  { %426 = vadd.xlane.f32.xlu0 %v425_v9 }
 0xbfd   :  { %v405_v10 = vpop.xlane.xlu0 %404 }
 0xbfe   :  { %v406_v11 = vsel %vm402_vm3, %v405_v10, %v388_v58 }
 0xbff   :  { %v421_v12 = vmul.f32 %v417_v6, %v406_v11 }
 0xc01   :  { %422 = vadd.xlane.f32.xlu1 %v421_v12  ;;  %v413_v13 = vpop.xlane.xlu0 %412 }
 0xc02   :  { %v414_v14 = vsel %vm402_vm3, %v413_v13, %v396_v61  ;;  %vm652_vm3 = vweird.f32 %v775_v43 }
 0xc03   :  { %v429_v15 = vmul.f32 %v417_v6, %v414_v14 }
 0xc05   :  { %430 = vadd.xlane.f32.xlu1 %v429_v15 }
 0xc17   :  { %v427_v18 = vpop.xlane.xlu0 %426 }
 0xc18   :  { %v428_v20 = vsel %vm420_vm4, %v427_v18, %v410_v8 }
 0xc19   :  { %v443_v21 = vmul.f32 %v435_v19, %v428_v20 }
 0xc1b   :  { %444 = vadd.xlane.f32.xlu1 %v443_v21 }
 0xc1f   :  { %103 = vadd.xlane.f32.xlu1 %v102_v23 }
 0xc8e   :  { %v423_v24 = vpop.xlane.xlu1 %422 }
 0xc8f   :  { %v424_v25 = vsel %vm420_vm4, %v423_v24, %v406_v11 }
 0xc90   :  { %v439_v3 = vmul.f32 %v435_v19, %v424_v25 }
 0xc92   :  { %440 = vadd.xlane.f32.xlu0 %v439_v3  ;;  %v431_v26 = vpop.xlane.xlu1 %430 }
 0xc93   :  { %v432_v27 = vsel %vm420_vm4, %v431_v26, %v414_v14 }
 0xc94   :  { %v447_v28 = vmul.f32 %v435_v19, %v432_v27 }
 0xc96   :  { %448 = vadd.xlane.f32.xlu0 %v447_v28 }
 0xca8   :  { %v445_v30 = vpop.xlane.xlu1 %444 }
 0xca9   :  { %v446_v32 = vsel %vm438_vm6, %v445_v30, %v428_v20 }
 0xcaa   :  { %v461_v33 = vmul.f32 %v453_v31, %v446_v32 }
 0xcac   :  { %462 = vadd.xlane.f32.xlu1 %v461_v33  ;;  %v832_v34 = vpop.xlane.xlu1 %103 }
 0xcad   :  { %728 = vrcp.f32 %v832_v34  ;;  %vm664_vm4 = vweird.f32 %v832_v34 }
 0xcb7   :  { %v838_v36 = vpop.eup %728 }
 0xcb8   :  { %v109_v37 = vmul.f32 %v838_v36, %v107_v35 }
 0xcba   :  { %110 = vst [vmem:[#allocation2 + $0x18] sm:$0xff] %v109_v37 }
 0xcc1   :  { %v470_v46 = vld [vmem:[#allocation2 + $0x18] ss:$0 sm:$0xff]  ;;  %v492_v60 = vld [vmem:[#allocation2 + $0x19] ss:$0 sm:$0xff]  ;;  %v514_v15 = vld [vmem:[#allocation2 + $0x1a] ss:$0 sm:$0xff] }
 0xcc2   :  { %v471_v47 = vxor.u32 2147483648, %v470_v46  ;;  %v493_v63 = vxor.u32 2147483648, %v492_v60  ;;  %v515_v17 = vxor.u32 2147483648, %v514_v15  ;;  %v536_v28 = vld [vmem:[#allocation2 + $0x1b] ss:$0 sm:$0xff] }
 0xcc3   :  { %v537_v30 = vxor.u32 2147483648, %v536_v28  ;;  %v558_v46 = vld [vmem:[#allocation2 + $0x1c] ss:$0 sm:$0xff] }
 0xcc4   :  { %v487_v52 = vmul.f32 %v471_v47, %v142_v50 }
 0xd1f   :  { %v441_v38 = vpop.xlane.xlu0 %440 }
 0xd20   :  { %v442_v39 = vsel %vm438_vm6, %v441_v38, %v424_v25 }
 0xd21   :  { %v457_v40 = vmul.f32 %v453_v31, %v442_v39 }
 0xd23   :  { %458 = vadd.xlane.f32.xlu0 %v457_v40  ;;  %v449_v41 = vpop.xlane.xlu0 %448 }
 0xd24   :  { %v450_v42 = vsel %vm438_vm6, %v449_v41, %v432_v27  ;;  %vm658_vm6 = vweird.f32 %v800_v62 }
 0xd25   :  { %v465_v44 = vmul.f32 %v453_v31, %v450_v42 }
 0xd27   :  { %466 = vadd.xlane.f32.xlu0 %v465_v44 }
 0xd39   :  { %v463_v48 = vpop.xlane.xlu1 %462 }
 0xd3a   :  { %v464_v49 = vsel %vm456_vm1, %v463_v48, %v446_v32  ;;  %v559_v48 = vxor.u32 2147483648, %v558_v46 }
 0xd3b   :  { %v479_v51 = vmul.f32 %v471_v47, %v464_v49 }
 0xd3d   :  { %480 = vadd.xlane.f32.xlu0 %v479_v51 }
 0xd41   :  { %488 = vadd.xlane.f32.xlu0 %v487_v52 }
 0xdb0   :  { %v459_v54 = vpop.xlane.xlu0 %458 }
 0xdb1   :  { %v460_v55 = vsel %vm456_vm1, %v459_v54, %v442_v39 }
 0xdb2   :  { %v475_v56 = vmul.f32 %v471_v47, %v460_v55 }
 0xdb4   :  { %v467_v57 = vpop.xlane.xlu0 %466  ;;  %476 = vadd.xlane.f32.xlu1 %v475_v56 }
 0xdb5   :  { %v468_v58 = vsel %vm456_vm1, %v467_v57, %v450_v42 }
 0xdb6   :  { %v483_v59 = vmul.f32 %v471_v47, %v468_v58 }
 0xdb8   :  { %484 = vadd.xlane.f32.xlu1 %v483_v59 }
 0xdca   :  { %v481_v61 = vpop.xlane.xlu0 %480 }
 0xdcb   :  { %v482_v1 = vsel %vm474_vm10, %v481_v61, %v464_v49  ;;  %v580_v61 = vld [vmem:[#allocation2 + $0x1d] ss:$0 sm:$0xff] }
 0xdcc   :  { %v501_v4 = vmul.f32 %v493_v63, %v482_v1 }
 0xdce   :  { %502 = vadd.xlane.f32.xlu0 %v501_v4  ;;  %v489_v53 = vpop.xlane.xlu0 %488 }
 0xdcf   :  { %v490_v6 = vsel %vm474_vm10, %v489_v53, %v142_v50 }
 0xdd0   :  { %v509_v8 = vmul.f32 %v493_v63, %v490_v6 }
 0xdd2   :  { %510 = vadd.xlane.f32.xlu0 %v509_v8 }
 0xe41   :  { %v477_v9 = vpop.xlane.xlu1 %476 }
 0xe42   :  { %v478_v10 = vsel %vm474_vm10, %v477_v9, %v460_v55 }
 0xe43   :  { %v497_v11 = vmul.f32 %v493_v63, %v478_v10 }
 0xe45   :  { %498 = vadd.xlane.f32.xlu1 %v497_v11  ;;  %v485_v12 = vpop.xlane.xlu1 %484 }
 0xe46   :  { %v486_v13 = vsel %vm474_vm10, %v485_v12, %v468_v58 }
 0xe47   :  { %v505_v14 = vmul.f32 %v493_v63, %v486_v13 }
 0xe49   :  { %506 = vadd.xlane.f32.xlu1 %v505_v14 }
 0xe5b   :  { %v503_v16 = vpop.xlane.xlu0 %502 }
 0xe5c   :  { %v504_v18 = vsel %vm496_vm11, %v503_v16, %v482_v1  ;;  %v581_v1 = vxor.u32 2147483648, %v580_v61  ;;  %v602_v16 = vld [vmem:[#allocation2 + $0x1e] ss:$0 sm:$0xff] }
 0xe5d   :  { %v523_v19 = vmul.f32 %v515_v17, %v504_v18 }
 0xe5f   :  { %524 = vadd.xlane.f32.xlu0 %v523_v19  ;;  %v511_v20 = vpop.xlane.xlu0 %510 }
 0xe60   :  { %v512_v21 = vsel %vm496_vm11, %v511_v20, %v490_v6 }
 0xe61   :  { %v531_v22 = vmul.f32 %v515_v17, %v512_v21 }
 0xe63   :  { %532 = vadd.xlane.f32.xlu0 %v531_v22 }
 0xed2   :  { %v499_v23 = vpop.xlane.xlu1 %498 }
 0xed3   :  { %v500_v24 = vsel %vm496_vm11, %v499_v23, %v478_v10 }
 0xed4   :  { %v519_v25 = vmul.f32 %v515_v17, %v500_v24 }
 0xed6   :  { %520 = vadd.xlane.f32.xlu1 %v519_v25  ;;  %v507_v3 = vpop.xlane.xlu1 %506 }
 0xed7   :  { %v508_v26 = vsel %vm496_vm11, %v507_v3, %v486_v13 }
 0xed8   :  { %v527_v27 = vmul.f32 %v515_v17, %v508_v26 }
 0xeda   :  { %528 = vadd.xlane.f32.xlu1 %v527_v27 }
 0xeec   :  { %v525_v29 = vpop.xlane.xlu0 %524 }
 0xeed   :  { %v526_v31 = vsel %vm518_vm12, %v525_v29, %v504_v18  ;;  %v603_v18 = vxor.u32 2147483648, %v602_v16  ;;  %v624_v29 = vld [vmem:[#allocation2 + $0x1f] ss:$0 sm:$0xff] }
 0xeee   :  { %v545_v32 = vmul.f32 %v537_v30, %v526_v31 }
 0xef0   :  { %546 = vadd.xlane.f32.xlu0 %v545_v32  ;;  %v533_v33 = vpop.xlane.xlu0 %532 }
 0xef1   :  { %v534_v35 = vsel %vm518_vm12, %v533_v33, %v512_v21 }
 0xef2   :  { %v553_v37 = vmul.f32 %v537_v30, %v534_v35 }
 0xef4   :  { %554 = vadd.xlane.f32.xlu0 %v553_v37 }
 0xf63   :  { %v521_v38 = vpop.xlane.xlu1 %520 }
 0xf64   :  { %v522_v39 = vsel %vm518_vm12, %v521_v38, %v500_v24 }
 0xf65   :  { %v541_v40 = vmul.f32 %v537_v30, %v522_v39 }
 0xf67   :  { %542 = vadd.xlane.f32.xlu1 %v541_v40  ;;  %v529_v41 = vpop.xlane.xlu1 %528 }
 0xf68   :  { %v530_v42 = vsel %vm518_vm12, %v529_v41, %v508_v26 }
 0xf69   :  { %v549_v44 = vmul.f32 %v537_v30, %v530_v42 }
 0xf6b   :  { %550 = vadd.xlane.f32.xlu1 %v549_v44 }
 0xf7d   :  { %v547_v47 = vpop.xlane.xlu0 %546 }
 0xf7e   :  { %v548_v49 = vsel %vm540_vm13, %v547_v47, %v526_v31  ;;  %v625_v31 = vxor.u32 2147483648, %v624_v29 }
 0xf7f   :  { %v567_v50 = vmul.f32 %v559_v48, %v548_v49 }
 0xf81   :  { %568 = vadd.xlane.f32.xlu0 %v567_v50  ;;  %v555_v51 = vpop.xlane.xlu0 %554 }
 0xf82   :  { %v556_v52 = vsel %vm540_vm13, %v555_v51, %v534_v35 }
 0xf83   :  { %v575_v54 = vmul.f32 %v559_v48, %v556_v52 }
 0xf85   :  { %576 = vadd.xlane.f32.xlu0 %v575_v54 }
 0xff4   :  { %v543_v55 = vpop.xlane.xlu1 %542 }
 0xff5   :  { %v544_v56 = vsel %vm540_vm13, %v543_v55, %v522_v39 }
 0xff6   :  { %v563_v57 = vmul.f32 %v559_v48, %v544_v56 }
 0xff8   :  { %564 = vadd.xlane.f32.xlu1 %v563_v57  ;;  %v551_v58 = vpop.xlane.xlu1 %550 }
 0xff9   :  { %v552_v59 = vsel %vm540_vm13, %v551_v58, %v530_v42 }
 0xffa   :  { %v571_v60 = vmul.f32 %v559_v48, %v552_v59 }
 0xffc   :  { %572 = vadd.xlane.f32.xlu1 %v571_v60 }
0x100e   :  { %v569_v63 = vpop.xlane.xlu0 %568 }
0x100f   :  { %v570_v4 = vsel %vm562_vm14, %v569_v63, %v548_v49 }
0x1010   :  { %v589_v53 = vmul.f32 %v581_v1, %v570_v4 }
0x1012   :  { %590 = vadd.xlane.f32.xlu0 %v589_v53  ;;  %v577_v6 = vpop.xlane.xlu0 %576 }
0x1013   :  { %v578_v8 = vsel %vm562_vm14, %v577_v6, %v556_v52 }
0x1014   :  { %v597_v9 = vmul.f32 %v581_v1, %v578_v8 }
0x1016   :  { %598 = vadd.xlane.f32.xlu0 %v597_v9 }
0x1085   :  { %v565_v10 = vpop.xlane.xlu1 %564 }
0x1086   :  { %v566_v11 = vsel %vm562_vm14, %v565_v10, %v544_v56 }
0x1087   :  { %v585_v12 = vmul.f32 %v581_v1, %v566_v11 }
0x1089   :  { %586 = vadd.xlane.f32.xlu1 %v585_v12  ;;  %v573_v13 = vpop.xlane.xlu1 %572 }
0x108a   :  { %v574_v14 = vsel %vm562_vm14, %v573_v13, %v552_v59 }
0x108b   :  { %v593_v15 = vmul.f32 %v581_v1, %v574_v14 }
0x108d   :  { %594 = vadd.xlane.f32.xlu1 %v593_v15 }
0x109f   :  { %v591_v17 = vpop.xlane.xlu0 %590 }
0x10a0   :  { %v592_v19 = vsel %vm584_vm15, %v591_v17, %v570_v4 }
0x10a1   :  { %v611_v20 = vmul.f32 %v603_v18, %v592_v19 }
0x10a3   :  { %612 = vadd.xlane.f32.xlu0 %v611_v20  ;;  %v599_v21 = vpop.xlane.xlu0 %598 }
0x10a4   :  { %v600_v22 = vsel %vm584_vm15, %v599_v21, %v578_v8 }
0x10a5   :  { %v619_v23 = vmul.f32 %v603_v18, %v600_v22 }
0x10a7   :  { %620 = vadd.xlane.f32.xlu0 %v619_v23 }
0x1116   :  { %v587_v24 = vpop.xlane.xlu1 %586 }
0x1117   :  { %v588_v25 = vsel %vm584_vm15, %v587_v24, %v566_v11 }
0x1118   :  { %v607_v3 = vmul.f32 %v603_v18, %v588_v25 }
0x111a   :  { %608 = vadd.xlane.f32.xlu1 %v607_v3  ;;  %v595_v26 = vpop.xlane.xlu1 %594 }
0x111b   :  { %v596_v27 = vsel %vm584_vm15, %v595_v26, %v574_v14 }
0x111c   :  { %v615_v28 = vmul.f32 %v603_v18, %v596_v27 }
0x111e   :  { %616 = vadd.xlane.f32.xlu1 %v615_v28 }
0x1130   :  { %v613_v30 = vpop.xlane.xlu0 %612 }
0x1131   :  { %v614_v32 = vsel %vm606_vm0, %v613_v30, %v592_v19 }
0x1132   :  { %v633_v33 = vmul.f32 %v625_v31, %v614_v32 }
0x1134   :  { %634 = vadd.xlane.f32.xlu0 %v633_v33  ;;  %v621_v35 = vpop.xlane.xlu0 %620 }
0x1135   :  { %v622_v37 = vsel %vm606_vm0, %v621_v35, %v600_v22 }
0x1136   :  { %v641_v38 = vmul.f32 %v625_v31, %v622_v37 }
0x1138   :  { %642 = vadd.xlane.f32.xlu0 %v641_v38 }
0x11a7   :  { %v609_v39 = vpop.xlane.xlu1 %608 }
0x11a8   :  { %v610_v40 = vsel %vm606_vm0, %v609_v39, %v588_v25 }
0x11a9   :  { %v629_v41 = vmul.f32 %v625_v31, %v610_v40 }
0x11ab   :  { %630 = vadd.xlane.f32.xlu1 %v629_v41  ;;  %v617_v42 = vpop.xlane.xlu1 %616 }
0x11ac   :  { %v618_v44 = vsel %vm606_vm0, %v617_v42, %v596_v27 }
0x11ad   :  { %v637_v46 = vmul.f32 %v625_v31, %v618_v44 }
0x11af   :  { %638 = vadd.xlane.f32.xlu1 %v637_v46 }
0x11c1   :  { %v635_v47 = vpop.xlane.xlu0 %634 }
0x11c2   :  { %v636_v48 = vsel %vm628_vm2, %v635_v47, %v614_v32 }
0x11c3   :  { %v651_v49 = vmul.f32 %v781_v45, %v636_v48 }
0x11c5   :  { %v653_v50 = vsel %vm652_vm3, %v636_v48, %v651_v49  ;;  %v643_v51 = vpop.xlane.xlu0 %642 }
0x11c6   :  { %704 = vst [vmem:[%s885_s1 + $0x8] sm:$0xff] %v653_v50  ;;  %v644_v52 = vsel %vm628_vm2, %v643_v51, %v622_v37 }
0x11c7   :  { %v663_v54 = vmul.f32 %v838_v36, %v644_v52 }
0x11c9   :  { %v665_v55 = vsel %vm664_vm4, %v644_v52, %v663_v54 }
0x11ca   :  { %708 = vst [vmem:[%s885_s1 + $0x18] sm:$0xff] %v665_v55 }
0x1238   :  { %v631_v45 = vpop.xlane.xlu1 %630 }
0x1239   :  { %v632_v43 = vsel %vm628_vm2, %v631_v45, %v610_v40 }
0x123a   :  { %v646_v56 = vmul.f32 %v759_v7, %v632_v43 }
0x123c   :  { %v648_v57 = vsel %vm647_vm5, %v632_v43, %v646_v56  ;;  %v639_v58 = vpop.xlane.xlu1 %638 }
0x123d   :  { %702 = vst [vmem:[%s885_s1] sm:$0xff] %v648_v57  ;;  %v640_v34 = vsel %vm628_vm2, %v639_v58, %v618_v44 }
0x123e   :  { %v657_v36 = vmul.f32 %v806_v0, %v640_v34 }
0x1240   :  { %v659_v59 = vsel %vm658_vm6, %v640_v34, %v657_v36 }
0x1241   :  { %706 = vst [vmem:[%s885_s1 + $0x10] sm:$0xff] %v659_v59 }

// kernel: custom-call.13
= control target key start
LH: loop header
LB: loop body
LE: loop exit
PB: predicated region body
PF: predicated region fallthrough
CT: control target
= control target key end

     0   :  { %v46_v0 = vlaneseq  ;;  %v729_v10 = vmov -1.0   ;;  %v730_v48 = vmov 0.0   ;;  %s1003_s0 = inlined_call_operand.vmem [shape: f32[1,32,32], index: 0, kind: input, shape index: {}]   ;;  %s1004_s1 = inlined_call_operand.vmem [shape: f32[1,32,32], index: 1, kind: output, shape index: {}]  }
   0x1   :  { %v41_v3 = vld [vmem:[%s1003_s0 + $0x18] sm:$0xff]  ;;  %v39_v37 = vld [vmem:[%s1003_s0 + $0x10] sm:$0xff] }
   0x2   :  { %v741_v1 = vand.u32 127, %v46_v0  ;;  %v743_v2 = vshrl.u32 %v46_v0, 7 }
   0x4   :  { %vm48_vm0 = vcmp.lt.s32.totalorder %v741_v1, 32  ;;  %v99_v4 = vadd.s32 24, %v743_v2  ;;  %vm140_vm4 = vcmp.eq.s32.totalorder %v741_v1, 31  ;;  %vm148_vm6 = vcmp.eq.s32.totalorder %v741_v1, 30 }
   0x5   :  { %v141_v11 = vsel %vm140_vm4, 1.0, %v729_v10  ;;  %vm158_vm7 = vcmp.eq.s32.totalorder %v741_v1, 29  ;;  %vm168_vm8 = vcmp.eq.s32.totalorder %v741_v1, 28  ;;  %vm178_vm9 = vcmp.eq.s32.totalorder %v741_v1, 27 }
   0x6   :  { %vm100_vm1 = vcmp.eq.s32.totalorder %v99_v4, %v741_v1  ;;  %vm105_vm2 = vcmp.le.s32.totalorder %v99_v4, %v741_v1  ;;  %vm137_vm5 = vcmp.eq.s32.totalorder %v741_v1, %v99_v4  ;;  %v83_v32 = vadd.s32 16, %v743_v2 }
   0x7   :  { %v102_v5 = vsel %vm100_vm1, %v41_v3, 0.0  ;;  %vm106_vm3 = vmand %vm105_vm2, %vm48_vm0  ;;  %v142_v12 = vsel %vm137_vm5, %v141_v11, 0.0  ;;  %vm188_vm11 = vcmp.eq.s32.totalorder %v741_v1, 26  ;;  %vm198_vm15 = vcmp.eq.s32.totalorder %v741_v1, 25 }
   0x8   :  { %v107_v6 = vsel %vm106_vm3, %v41_v3, 0.0  ;;  %103 = vadd.xlane.f32.xlu0 %v102_v5  ;;  %vm84_vm10 = vcmp.eq.s32.totalorder %v83_v32, %v741_v1  ;;  %vm89_vm12 = vcmp.le.s32.totalorder %v83_v32, %v741_v1  ;;  %vm130_vm14 = vcmp.eq.s32.totalorder %v741_v1, %v83_v32 }
   0x9   :  { %v86_v38 = vsel %vm84_vm10, %v39_v37, 0.0  ;;  %vm90_vm13 = vmand %vm89_vm12, %vm48_vm0  ;;  %v131_v49 = vsel %vm130_vm14, -1.0, %v730_v48  ;;  %vm218_vm1 = vcmp.eq.s32.totalorder %v741_v1, 23  ;;  %vm208_vm2 = vcmp.eq.s32.totalorder %v741_v1, 24 }
   0xa   :  { %v91_v45 = vsel %vm90_vm13, %v39_v37, 0.0  ;;  %vm232_vm3 = vcmp.eq.s32.totalorder %v741_v1, 22  ;;  %vm246_vm4 = vcmp.eq.s32.totalorder %v741_v1, 21  ;;  %vm260_vm5 = vcmp.eq.s32.totalorder %v741_v1, 20 }
   0xb   :  { %vm316_vm13 = vcmp.eq.s32.totalorder %v741_v1, 16  ;;  %vm330_vm14 = vcmp.eq.s32.totalorder %v741_v1, 15 }
  0x95   :  { %v754_v7 = vpop.xlane.xlu0 %103 }
  0x96   :  { %721 = vrcp.f32 %v754_v7 }
  0xa0   :  { %v757_v8 = vpop.eup %721 }
  0xa1   :  { %v109_v9 = vmul.f32 %v757_v8, %v107_v6 }
  0xa3   :  { %110 = vst [vmem:[#allocation2 + $0x18] sm:$0xff] %v109_v9 }
  0xaa   :  { %v144_v13 = vld [vmem:[#allocation2 + $0x1e] ss:$0 sm:$0xff]  ;;  %v154_v16 = vld [vmem:[#allocation2 + $0x1d] ss:$0 sm:$0xff]  ;;  %v164_v21 = vld [vmem:[#allocation2 + $0x1c] ss:$0 sm:$0xff] }
  0xab   :  { %v145_v14 = vxor.u32 2147483648, %v144_v13  ;;  %v155_v18 = vxor.u32 2147483648, %v154_v16  ;;  %v165_v23 = vxor.u32 2147483648, %v164_v21  ;;  %v174_v26 = vld [vmem:[#allocation2 + $0x1b] ss:$0 sm:$0xff] }
  0xac   :  { %v175_v28 = vxor.u32 2147483648, %v174_v26  ;;  %v184_v31 = vld [vmem:[#allocation2 + $0x1a] ss:$0 sm:$0xff]  ;;  %v194_v39 = vld [vmem:[#allocation2 + $0x19] ss:$0 sm:$0xff] }
  0xad   :  { %v149_v15 = vmul.f32 %v145_v14, %v142_v12  ;;  %v185_v34 = vxor.u32 2147483648, %v184_v31  ;;  %v195_v41 = vxor.u32 2147483648, %v194_v39  ;;  %v204_v53 = vld [vmem:[#allocation2 + $0x18] ss:$0 sm:$0xff]  ;;  %v67_v39 = vadd.s32 8, %v743_v2 }
  0xae   :  { %v205_v55 = vxor.u32 2147483648, %v204_v53 }
  0xaf   :  { %150 = vadd.xlane.f32.xlu0 %v149_v15  ;;  %vm123_vm12 = vcmp.eq.s32.totalorder %v741_v1, %v67_v39 }
 0x13c   :  { %v151_v17 = vpop.xlane.xlu0 %150 }
 0x13d   :  { %v152_v19 = vsel %vm148_vm6, %v151_v17, %v142_v12  ;;  %vm274_vm6 = vcmp.eq.s32.totalorder %v741_v1, 19 }
 0x13e   :  { %v159_v20 = vmul.f32 %v155_v18, %v152_v19 }
 0x140   :  { %160 = vadd.xlane.f32.xlu1 %v159_v20 }
 0x1cd   :  { %v161_v22 = vpop.xlane.xlu1 %160 }
 0x1ce   :  { %v162_v24 = vsel %vm158_vm7, %v161_v22, %v152_v19  ;;  %vm288_vm7 = vcmp.eq.s32.totalorder %v741_v1, 18 }
 0x1cf   :  { %v169_v25 = vmul.f32 %v165_v23, %v162_v24 }
 0x1d1   :  { %170 = vadd.xlane.f32.xlu1 %v169_v25 }
 0x25e   :  { %v171_v27 = vpop.xlane.xlu1 %170 }
 0x25f   :  { %v172_v29 = vsel %vm168_vm8, %v171_v27, %v162_v24  ;;  %vm68_vm8 = vcmp.eq.s32.totalorder %v67_v39, %v741_v1 }
 0x260   :  { %v179_v30 = vmul.f32 %v175_v28, %v172_v29 }
 0x262   :  { %180 = vadd.xlane.f32.xlu0 %v179_v30 }
 0x2ef   :  { %v181_v33 = vpop.xlane.xlu0 %180 }
 0x2f0   :  { %v182_v35 = vsel %vm178_vm9, %v181_v33, %v172_v29  ;;  %vm73_vm9 = vcmp.le.s32.totalorder %v67_v39, %v741_v1 }
 0x2f1   :  { %v189_v36 = vmul.f32 %v185_v34, %v182_v35  ;;  %vm74_vm10 = vmand %vm73_vm9, %vm48_vm0  ;;  %vm116_vm9 = vcmp.eq.s32.totalorder %v741_v1, %v743_v2 }
 0x2f3   :  { %190 = vadd.xlane.f32.xlu1 %v189_v36 }
 0x2f7   :  { %87 = vadd.xlane.f32.xlu1 %v86_v38 }
 0x380   :  { %v191_v40 = vpop.xlane.xlu1 %190 }
 0x381   :  { %v192_v42 = vsel %vm188_vm11, %v191_v40, %v182_v35  ;;  %vm302_vm11 = vcmp.eq.s32.totalorder %v741_v1, 17 }
 0x382   :  { %v199_v43 = vmul.f32 %v195_v41, %v192_v42 }
 0x384   :  { %200 = vadd.xlane.f32.xlu0 %v199_v43  ;;  %v772_v44 = vpop.xlane.xlu1 %87 }
 0x385   :  { %723 = vrcp.f32 %v772_v44 }
 0x38f   :  { %v778_v46 = vpop.eup %723 }
 0x390   :  { %v93_v47 = vmul.f32 %v778_v46, %v91_v45  ;;  %v37_v45 = vld [vmem:[%s1003_s0 + $0x8] sm:$0xff] }
 0x392   :  { %94 = vst [vmem:[#allocation2 + $0x10] sm:$0xff] %v93_v47  ;;  %v70_v47 = vsel %vm68_vm8, %v37_v45, 0.0 }
 0x399   :  { %v214_v50 = vld [vmem:[#allocation2 + $0x17] ss:$0 sm:$0xff]  ;;  %v228_v58 = vld [vmem:[#allocation2 + $0x16] ss:$0 sm:$0xff]  ;;  %v242_v4 = vld [vmem:[#allocation2 + $0x15] ss:$0 sm:$0xff] }
 0x39a   :  { %v215_v51 = vxor.u32 2147483648, %v214_v50  ;;  %v229_v59 = vxor.u32 2147483648, %v228_v58  ;;  %v243_v6 = vxor.u32 2147483648, %v242_v4  ;;  %v256_v14 = vld [vmem:[#allocation2 + $0x14] ss:$0 sm:$0xff] }
 0x39b   :  { %v257_v16 = vxor.u32 2147483648, %v256_v14  ;;  %v270_v22 = vld [vmem:[#allocation2 + $0x13] ss:$0 sm:$0xff]  ;;  %v284_v30 = vld [vmem:[#allocation2 + $0x12] ss:$0 sm:$0xff] }
 0x39c   :  { %v219_v52 = vmul.f32 %v215_v51, %v131_v49  ;;  %v271_v24 = vxor.u32 2147483648, %v270_v22  ;;  %v285_v32 = vxor.u32 2147483648, %v284_v30  ;;  %v298_v38 = vld [vmem:[#allocation2 + $0x11] ss:$0 sm:$0xff] }
 0x39d   :  { %v299_v41 = vxor.u32 2147483648, %v298_v38 }
 0x39e   :  { %220 = vadd.xlane.f32.xlu1 %v219_v52 }
 0x411   :  { %v201_v54 = vpop.xlane.xlu0 %200 }
 0x412   :  { %v202_v56 = vsel %vm198_vm15, %v201_v54, %v192_v42  ;;  %v75_v54 = vsel %vm74_vm10, %v37_v45, 0.0  ;;  %vm348_vm15 = vcmp.eq.s32.totalorder %v741_v1, 14  ;;  %vm474_vm10 = vcmp.eq.s32.totalorder %v741_v1, 7 }
 0x413   :  { %v209_v57 = vmul.f32 %v205_v55, %v202_v56 }
 0x415   :  { %210 = vadd.xlane.f32.xlu0 %v209_v57 }
 0x42b   :  { %v221_v60 = vpop.xlane.xlu1 %220 }
 0x42c   :  { %v222_v61 = vsel %vm218_vm1, %v221_v60, %v131_v49 }
 0x42d   :  { %v233_v62 = vmul.f32 %v229_v59, %v222_v61 }
 0x42f   :  { %234 = vadd.xlane.f32.xlu1 %v233_v62 }
 0x4a2   :  { %v211_v63 = vpop.xlane.xlu0 %210 }
 0x4a3   :  { %v212_v0 = vsel %vm208_vm2, %v211_v63, %v202_v56  ;;  %vm384_vm2 = vcmp.eq.s32.totalorder %v741_v1, 12 }
 0x4a4   :  { %v223_v3 = vmul.f32 %v215_v51, %v212_v0 }
 0x4a6   :  { %224 = vadd.xlane.f32.xlu0 %v223_v3  ;;  %v124_v3 = vsel %vm123_vm12, -1.0, %v730_v48  ;;  %vm518_vm12 = vcmp.eq.s32.totalorder %v741_v1, 5 }
 0x4bc   :  { %v235_v5 = vpop.xlane.xlu1 %234 }
 0x4bd   :  { %v236_v9 = vsel %vm232_vm3, %v235_v5, %v222_v61 }
 0x4be   :  { %v247_v10 = vmul.f32 %v243_v6, %v236_v9 }
 0x4c0   :  { %248 = vadd.xlane.f32.xlu1 %v247_v10 }
 0x533   :  { %v225_v11 = vpop.xlane.xlu0 %224 }
 0x534   :  { %v226_v12 = vsel %vm218_vm1, %v225_v11, %v212_v0  ;;  %vm366_vm1 = vcmp.eq.s32.totalorder %v741_v1, 13 }
 0x535   :  { %v237_v13 = vmul.f32 %v229_v59, %v226_v12  ;;  %v312_v59 = vld [vmem:[#allocation2 + $0x10] ss:$0 sm:$0xff] }
 0x536   :  { %v313_v63 = vxor.u32 2147483648, %v312_v59 }
 0x537   :  { %238 = vadd.xlane.f32.xlu0 %v237_v13 }
 0x54d   :  { %v249_v15 = vpop.xlane.xlu1 %248 }
 0x54e   :  { %v250_v17 = vsel %vm246_vm4, %v249_v15, %v236_v9 }
 0x54f   :  { %v261_v18 = vmul.f32 %v257_v16, %v250_v17 }
 0x551   :  { %262 = vadd.xlane.f32.xlu1 %v261_v18 }
 0x5c4   :  { %v239_v19 = vpop.xlane.xlu0 %238 }
 0x5c5   :  { %v240_v20 = vsel %vm232_vm3, %v239_v19, %v226_v12  ;;  %vm402_vm3 = vcmp.eq.s32.totalorder %v741_v1, 11 }
 0x5c6   :  { %v251_v21 = vmul.f32 %v243_v6, %v240_v20 }
 0x5c8   :  { %252 = vadd.xlane.f32.xlu0 %v251_v21 }
 0x5de   :  { %v263_v23 = vpop.xlane.xlu1 %262 }
 0x5df   :  { %v264_v25 = vsel %vm260_vm5, %v263_v23, %v250_v17 }
 0x5e0   :  { %v275_v26 = vmul.f32 %v271_v24, %v264_v25 }
 0x5e2   :  { %276 = vadd.xlane.f32.xlu1 %v275_v26 }
 0x655   :  { %v253_v27 = vpop.xlane.xlu0 %252 }
 0x656   :  { %v254_v28 = vsel %vm246_vm4, %v253_v27, %v240_v20  ;;  %vm420_vm4 = vcmp.eq.s32.totalorder %v741_v1, 10 }
 0x657   :  { %v265_v29 = vmul.f32 %v257_v16, %v254_v28 }
 0x659   :  { %266 = vadd.xlane.f32.xlu0 %v265_v29 }
 0x66f   :  { %v277_v31 = vpop.xlane.xlu1 %276 }
 0x670   :  { %v278_v33 = vsel %vm274_vm6, %v277_v31, %v264_v25 }
 0x671   :  { %v289_v34 = vmul.f32 %v285_v32, %v278_v33 }
 0x673   :  { %290 = vadd.xlane.f32.xlu1 %v289_v34 }
 0x6e6   :  { %v267_v35 = vpop.xlane.xlu0 %266 }
 0x6e7   :  { %v268_v36 = vsel %vm260_vm5, %v267_v35, %v254_v28  ;;  %vm52_vm5 = vcmp.eq.s32.totalorder %v743_v2, %v741_v1 }
 0x6e8   :  { %v279_v37 = vmul.f32 %v271_v24, %v268_v36 }
 0x6ea   :  { %280 = vadd.xlane.f32.xlu0 %v279_v37 }
 0x700   :  { %v291_v40 = vpop.xlane.xlu1 %290 }
 0x701   :  { %v292_v42 = vsel %vm288_vm7, %v291_v40, %v278_v33 }
 0x702   :  { %v303_v43 = vmul.f32 %v299_v41, %v292_v42 }
 0x704   :  { %304 = vadd.xlane.f32.xlu1 %v303_v43 }
 0x708   :  { %71 = vadd.xlane.f32.xlu1 %v70_v47 }
 0x777   :  { %v281_v49 = vpop.xlane.xlu0 %280 }
 0x778   :  { %v282_v50 = vsel %vm274_vm6, %v281_v49, %v268_v36  ;;  %vm438_vm6 = vcmp.eq.s32.totalorder %v741_v1, 9 }
 0x779   :  { %v293_v51 = vmul.f32 %v285_v32, %v282_v50 }
 0x77b   :  { %294 = vadd.xlane.f32.xlu0 %v293_v51 }
 0x791   :  { %v305_v52 = vpop.xlane.xlu1 %304 }
 0x792   :  { %v306_v62 = vsel %vm302_vm11, %v305_v52, %v292_v42 }
 0x793   :  { %v317_v4 = vmul.f32 %v313_v63, %v306_v62 }
 0x795   :  { %v818_v53 = vpop.xlane.xlu1 %71 }
 0x796   :  { %725 = vrcp.f32 %v818_v53 }
 0x7a0   :  { %v824_v55 = vpop.eup %725 }
 0x7a1   :  { %v77_v56 = vmul.f32 %v824_v55, %v75_v54 }
 0x7a3   :  { %78 = vst [vmem:[#allocation2 + $0x8] sm:$0xff] %v77_v56 }
 0x7aa   :  { %v326_v60 = vld [vmem:[#allocation2 + $0xf] ss:$0 sm:$0xff]  ;;  %v344_v11 = vld [vmem:[#allocation2 + $0xe] ss:$0 sm:$0xff]  ;;  %v362_v24 = vld [vmem:[#allocation2 + $0xd] ss:$0 sm:$0xff] }
 0x7ab   :  { %v327_v0 = vxor.u32 2147483648, %v326_v60  ;;  %v345_v15 = vxor.u32 2147483648, %v344_v11  ;;  %v363_v27 = vxor.u32 2147483648, %v362_v24  ;;  %v380_v35 = vld [vmem:[#allocation2 + $0xc] ss:$0 sm:$0xff] }
 0x7ac   :  { %v381_v38 = vxor.u32 2147483648, %v380_v35  ;;  %v398_v49 = vld [vmem:[#allocation2 + $0xb] ss:$0 sm:$0xff] }
 0x7ad   :  { %v331_v5 = vmul.f32 %v327_v0, %v124_v3  ;;  %v399_v52 = vxor.u32 2147483648, %v398_v49 }
 0x808   :  { %v295_v57 = vpop.xlane.xlu0 %294 }
 0x809   :  { %v296_v58 = vsel %vm288_vm7, %v295_v57, %v282_v50  ;;  %vm57_vm7 = vcmp.le.s32.totalorder %v743_v2, %v741_v1 }
 0x80a   :  { %v307_v61 = vmul.f32 %v299_v41, %v296_v58  ;;  %vm58_vm8 = vmand %vm57_vm7, %vm48_vm0  ;;  %vm456_vm0 = vcmp.eq.s32.totalorder %v741_v1, 8 }
 0x80c   :  { %308 = vadd.xlane.f32.xlu0 %v307_v61 }
 0x810   :  { %318 = vadd.xlane.f32.xlu0 %v317_v4 }
 0x814   :  { %332 = vadd.xlane.f32.xlu0 %v331_v5 }
 0x899   :  { %v309_v6 = vpop.xlane.xlu0 %308 }
 0x89a   :  { %v310_v9 = vsel %vm302_vm11, %v309_v6, %v296_v58  ;;  %vm496_vm11 = vcmp.eq.s32.totalorder %v741_v1, 6 }
 0x89b   :  { %v321_v10 = vmul.f32 %v313_v63, %v310_v9 }
 0x89d   :  { %v319_v12 = vpop.xlane.xlu0 %318  ;;  %322 = vadd.xlane.f32.xlu1 %v321_v10 }
 0x89e   :  { %v320_v13 = vsel %vm316_vm13, %v319_v12, %v306_v62  ;;  %v416_v62 = vld [vmem:[#allocation2 + $0xa] ss:$0 sm:$0xff] }
 0x89f   :  { %v335_v14 = vmul.f32 %v327_v0, %v320_v13 }
 0x8a1   :  { %336 = vadd.xlane.f32.xlu1 %v335_v14  ;;  %v333_v16 = vpop.xlane.xlu0 %332 }
 0x8a2   :  { %v334_v17 = vsel %vm330_vm14, %v333_v16, %v124_v3  ;;  %v417_v3 = vxor.u32 2147483648, %v416_v62 }
 0x8a3   :  { %v349_v18 = vmul.f32 %v345_v15, %v334_v17 }
 0x8a5   :  { %350 = vadd.xlane.f32.xlu1 %v349_v18 }
 0x92a   :  { %v323_v19 = vpop.xlane.xlu1 %322 }
 0x92b   :  { %v324_v20 = vsel %vm316_vm13, %v323_v19, %v310_v9  ;;  %vm540_vm13 = vcmp.eq.s32.totalorder %v741_v1, 4 }
 0x92c   :  { %v339_v21 = vmul.f32 %v327_v0, %v324_v20 }
 0x92e   :  { %340 = vadd.xlane.f32.xlu0 %v339_v21  ;;  %v337_v22 = vpop.xlane.xlu1 %336 }
 0x92f   :  { %v338_v23 = vsel %vm330_vm14, %v337_v22, %v320_v13  ;;  %v434_v13 = vld [vmem:[#allocation2 + $0x9] ss:$0 sm:$0xff] }
 0x930   :  { %v353_v25 = vmul.f32 %v345_v15, %v338_v23  ;;  %v435_v16 = vxor.u32 2147483648, %v434_v13 }
 0x932   :  { %354 = vadd.xlane.f32.xlu0 %v353_v25  ;;  %v351_v26 = vpop.xlane.xlu1 %350  ;;  %v35_v25 = vld [vmem:[%s1003_s0] sm:$0xff] }
 0x933   :  { %v352_v28 = vsel %vm348_vm15, %v351_v26, %v334_v17  ;;  %v54_v26 = vsel %vm52_vm5, %v35_v25, 0.0  ;;  %vm651_vm5 = vweird.f32 %v818_v53 }
 0x934   :  { %v367_v29 = vmul.f32 %v363_v27, %v352_v28 }
 0x936   :  { %368 = vadd.xlane.f32.xlu0 %v367_v29 }
 0x9bb   :  { %v341_v30 = vpop.xlane.xlu0 %340 }
 0x9bc   :  { %v342_v31 = vsel %vm330_vm14, %v341_v30, %v324_v20  ;;  %v452_v30 = vld [vmem:[#allocation2 + $0x8] ss:$0 sm:$0xff]  ;;  %vm562_vm14 = vcmp.eq.s32.totalorder %v741_v1, 3 }
 0x9bd   :  { %v357_v32 = vmul.f32 %v345_v15, %v342_v31 }
 0x9bf   :  { %358 = vadd.xlane.f32.xlu1 %v357_v32  ;;  %v355_v33 = vpop.xlane.xlu0 %354 }
 0x9c0   :  { %v356_v34 = vsel %vm348_vm15, %v355_v33, %v338_v23 }
 0x9c1   :  { %v371_v36 = vmul.f32 %v363_v27, %v356_v34 }
 0x9c3   :  { %372 = vadd.xlane.f32.xlu1 %v371_v36  ;;  %v369_v37 = vpop.xlane.xlu0 %368 }
 0x9c4   :  { %v370_v39 = vsel %vm366_vm1, %v369_v37, %v352_v28 }
 0x9c5   :  { %v385_v40 = vmul.f32 %v381_v38, %v370_v39 }
 0x9c7   :  { %386 = vadd.xlane.f32.xlu1 %v385_v40 }
 0xa4c   :  { %v359_v41 = vpop.xlane.xlu1 %358 }
 0xa4d   :  { %v360_v42 = vsel %vm348_vm15, %v359_v41, %v342_v31  ;;  %vm584_vm15 = vcmp.eq.s32.totalorder %v741_v1, 2 }
 0xa4e   :  { %v375_v43 = vmul.f32 %v363_v27, %v360_v42 }
 0xa50   :  { %376 = vadd.xlane.f32.xlu0 %v375_v43  ;;  %v373_v45 = vpop.xlane.xlu1 %372 }
 0xa51   :  { %v374_v47 = vsel %vm366_vm1, %v373_v45, %v356_v34  ;;  %v453_v34 = vxor.u32 2147483648, %v452_v30 }
 0xa52   :  { %v389_v50 = vmul.f32 %v381_v38, %v374_v47 }
 0xa54   :  { %390 = vadd.xlane.f32.xlu0 %v389_v50  ;;  %v387_v51 = vpop.xlane.xlu1 %386 }
 0xa55   :  { %v388_v54 = vsel %vm384_vm2, %v387_v51, %v370_v39  ;;  %v59_v39 = vsel %vm58_vm8, %v35_v25, 0.0 }
 0xa56   :  { %v403_v56 = vmul.f32 %v399_v52, %v388_v54 }
 0xa58   :  { %404 = vadd.xlane.f32.xlu0 %v403_v56 }
 0xadd   :  { %v377_v57 = vpop.xlane.xlu0 %376 }
 0xade   :  { %v378_v58 = vsel %vm366_vm1, %v377_v57, %v360_v42  ;;  %v117_v42 = vsel %vm116_vm9, -1.0, %v730_v48  ;;  %vm606_vm1 = vcmp.eq.s32.totalorder %v741_v1, 1 }
 0xadf   :  { %v393_v59 = vmul.f32 %v381_v38, %v378_v58 }
 0xae1   :  { %394 = vadd.xlane.f32.xlu1 %v393_v59  ;;  %v391_v60 = vpop.xlane.xlu0 %390 }
 0xae2   :  { %v392_v61 = vsel %vm384_vm2, %v391_v60, %v374_v47 }
 0xae3   :  { %v407_v63 = vmul.f32 %v399_v52, %v392_v61 }
 0xae5   :  { %408 = vadd.xlane.f32.xlu1 %v407_v63  ;;  %v405_v0 = vpop.xlane.xlu0 %404 }
 0xae6   :  { %v406_v4 = vsel %vm402_vm3, %v405_v0, %v388_v54 }
 0xae7   :  { %v421_v5 = vmul.f32 %v417_v3, %v406_v4 }
 0xae9   :  { %422 = vadd.xlane.f32.xlu1 %v421_v5 }
 0xb6e   :  { %v395_v6 = vpop.xlane.xlu1 %394 }
 0xb6f   :  { %v396_v9 = vsel %vm384_vm2, %v395_v6, %v378_v58  ;;  %vm627_vm2 = vcmp.eq.s32.totalorder %v741_v1, 0 }
 0xb70   :  { %v411_v10 = vmul.f32 %v399_v52, %v396_v9 }
 0xb72   :  { %412 = vadd.xlane.f32.xlu0 %v411_v10  ;;  %v409_v11 = vpop.xlane.xlu1 %408 }
 0xb73   :  { %v410_v12 = vsel %vm402_vm3, %v409_v11, %v392_v61 }
 0xb74   :  { %v425_v14 = vmul.f32 %v417_v3, %v410_v12 }
 0xb76   :  { %426 = vadd.xlane.f32.xlu0 %v425_v14  ;;  %v423_v15 = vpop.xlane.xlu1 %422 }
 0xb77   :  { %v424_v17 = vsel %vm420_vm4, %v423_v15, %v406_v4 }
 0xb78   :  { %v439_v18 = vmul.f32 %v435_v16, %v424_v17 }
 0xb7a   :  { %440 = vadd.xlane.f32.xlu0 %v439_v18 }
 0xbff   :  { %v413_v19 = vpop.xlane.xlu0 %412 }
 0xc00   :  { %v414_v20 = vsel %vm402_vm3, %v413_v19, %v396_v9 }
 0xc01   :  { %v429_v21 = vmul.f32 %v417_v3, %v414_v20 }
 0xc03   :  { %430 = vadd.xlane.f32.xlu1 %v429_v21  ;;  %v427_v22 = vpop.xlane.xlu0 %426 }
 0xc04   :  { %v428_v23 = vsel %vm420_vm4, %v427_v22, %v410_v12 }
 0xc05   :  { %v443_v24 = vmul.f32 %v435_v16, %v428_v23 }
 0xc07   :  { %444 = vadd.xlane.f32.xlu1 %v443_v24  ;;  %v441_v27 = vpop.xlane.xlu0 %440 }
 0xc08   :  { %v442_v32 = vsel %vm438_vm6, %v441_v27, %v424_v17 }
 0xc09   :  { %v457_v36 = vmul.f32 %v453_v34, %v442_v32 }
 0xc0b   :  { %55 = vadd.xlane.f32.xlu1 %v54_v26 }
 0xc90   :  { %v431_v28 = vpop.xlane.xlu1 %430 }
 0xc91   :  { %v432_v29 = vsel %vm420_vm4, %v431_v28, %v414_v20  ;;  %vm657_vm4 = vweird.f32 %v772_v44 }
 0xc92   :  { %v447_v31 = vmul.f32 %v435_v16, %v432_v29 }
 0xc94   :  { %448 = vadd.xlane.f32.xlu0 %v447_v31  ;;  %v445_v33 = vpop.xlane.xlu1 %444 }
 0xc95   :  { %v446_v35 = vsel %vm438_vm6, %v445_v33, %v428_v23 }
 0xc96   :  { %v461_v37 = vmul.f32 %v453_v34, %v446_v35 }
 0xc98   :  { %458 = vadd.xlane.f32.xlu0 %v457_v36  ;;  %462 = vadd.xlane.f32.xlu1 %v461_v37  ;;  %v889_v38 = vpop.xlane.xlu1 %55 }
 0xc99   :  { %727 = vrcp.f32 %v889_v38  ;;  %vm646_vm3 = vweird.f32 %v889_v38 }
 0xca3   :  { %v896_v40 = vpop.eup %727 }
 0xca4   :  { %v61_v41 = vmul.f32 %v896_v40, %v59_v39 }
 0xca6   :  { %62 = vst [vmem:[#allocation2] sm:$0xff] %v61_v41 }
 0xcad   :  { %v470_v43 = vld [vmem:[#allocation2 + $0x7] ss:$0 sm:$0xff]  ;;  %v492_v58 = vld [vmem:[#allocation2 + $0x6] ss:$0 sm:$0xff]  ;;  %v514_v12 = vld [vmem:[#allocation2 + $0x5] ss:$0 sm:$0xff] }
 0xcae   :  { %v471_v45 = vxor.u32 2147483648, %v470_v43  ;;  %v493_v59 = vxor.u32 2147483648, %v492_v58  ;;  %v515_v14 = vxor.u32 2147483648, %v514_v12  ;;  %v536_v26 = vld [vmem:[#allocation2 + $0x4] ss:$0 sm:$0xff] }
 0xcaf   :  { %v537_v28 = vxor.u32 2147483648, %v536_v26 }
 0xcb0   :  { %v475_v47 = vmul.f32 %v471_v45, %v117_v42 }
 0xcb2   :  { %476 = vadd.xlane.f32.xlu1 %v475_v47 }
 0xd21   :  { %v449_v49 = vpop.xlane.xlu0 %448 }
 0xd22   :  { %v450_v50 = vsel %vm438_vm6, %v449_v49, %v432_v29  ;;  %vm663_vm6 = vweird.f32 %v754_v7 }
 0xd23   :  { %v465_v51 = vmul.f32 %v453_v34, %v450_v50 }
 0xd25   :  { %466 = vadd.xlane.f32.xlu0 %v465_v51  ;;  %v459_v52 = vpop.xlane.xlu0 %458  ;;  %v463_v54 = vpop.xlane.xlu1 %462 }
 0xd26   :  { %v460_v56 = vsel %vm456_vm0, %v459_v52, %v442_v32  ;;  %v464_v2 = vsel %vm456_vm0, %v463_v54, %v446_v35 }
 0xd27   :  { %v479_v48 = vmul.f32 %v471_v45, %v460_v56  ;;  %v483_v57 = vmul.f32 %v471_v45, %v464_v2 }
 0xd29   :  { %480 = vadd.xlane.f32.xlu0 %v479_v48  ;;  %484 = vadd.xlane.f32.xlu1 %v483_v57 }
 0xd3f   :  { %v477_v60 = vpop.xlane.xlu1 %476 }
 0xd40   :  { %v478_v61 = vsel %vm474_vm10, %v477_v60, %v117_v42  ;;  %v558_v42 = vld [vmem:[#allocation2 + $0x3] ss:$0 sm:$0xff] }
 0xd41   :  { %v497_v62 = vmul.f32 %v493_v59, %v478_v61 }
 0xd43   :  { %498 = vadd.xlane.f32.xlu1 %v497_v62 }
 0xdb2   :  { %v467_v63 = vpop.xlane.xlu0 %466 }
 0xdb3   :  { %v468_v0 = vsel %vm456_vm0, %v467_v63, %v450_v50 }
 0xdb4   :  { %v487_v3 = vmul.f32 %v471_v45, %v468_v0  ;;  %v559_v45 = vxor.u32 2147483648, %v558_v42 }
 0xdb6   :  { %488 = vadd.xlane.f32.xlu0 %v487_v3  ;;  %v481_v4 = vpop.xlane.xlu0 %480  ;;  %v485_v5 = vpop.xlane.xlu1 %484 }
 0xdb7   :  { %v482_v6 = vsel %vm474_vm10, %v481_v4, %v460_v56  ;;  %v486_v9 = vsel %vm474_vm10, %v485_v5, %v464_v2 }
 0xdb8   :  { %v501_v10 = vmul.f32 %v493_v59, %v482_v6  ;;  %v505_v11 = vmul.f32 %v493_v59, %v486_v9 }
 0xdba   :  { %502 = vadd.xlane.f32.xlu0 %v501_v10  ;;  %506 = vadd.xlane.f32.xlu1 %v505_v11 }
 0xdd0   :  { %v499_v13 = vpop.xlane.xlu1 %498 }
 0xdd1   :  { %v500_v15 = vsel %vm496_vm11, %v499_v13, %v478_v61  ;;  %v602_v13 = vld [vmem:[#allocation2 + $0x1] ss:$0 sm:$0xff] }
 0xdd2   :  { %v519_v16 = vmul.f32 %v515_v14, %v500_v15 }
 0xdd4   :  { %520 = vadd.xlane.f32.xlu1 %v519_v16 }
 0xe43   :  { %v489_v17 = vpop.xlane.xlu0 %488 }
 0xe44   :  { %v490_v18 = vsel %vm474_vm10, %v489_v17, %v468_v0 }
 0xe45   :  { %v509_v19 = vmul.f32 %v493_v59, %v490_v18  ;;  %v580_v59 = vld [vmem:[#allocation2 + $0x2] ss:$0 sm:$0xff] }
 0xe46   :  { %v581_v61 = vxor.u32 2147483648, %v580_v59 }
 0xe47   :  { %510 = vadd.xlane.f32.xlu0 %v509_v19  ;;  %v503_v20 = vpop.xlane.xlu0 %502  ;;  %v507_v21 = vpop.xlane.xlu1 %506 }
 0xe48   :  { %v504_v22 = vsel %vm496_vm11, %v503_v20, %v482_v6  ;;  %v508_v23 = vsel %vm496_vm11, %v507_v21, %v486_v9 }
 0xe49   :  { %v523_v24 = vmul.f32 %v515_v14, %v504_v22  ;;  %v527_v25 = vmul.f32 %v515_v14, %v508_v23 }
 0xe4b   :  { %524 = vadd.xlane.f32.xlu0 %v523_v24  ;;  %528 = vadd.xlane.f32.xlu1 %v527_v25 }
 0xe61   :  { %v521_v27 = vpop.xlane.xlu1 %520 }
 0xe62   :  { %v522_v29 = vsel %vm518_vm12, %v521_v27, %v500_v15  ;;  %v603_v15 = vxor.u32 2147483648, %v602_v13  ;;  %v623_v27 = vld [vmem:[#allocation2] ss:$0 sm:$0xff] }
 0xe63   :  { %v541_v30 = vmul.f32 %v537_v28, %v522_v29 }
 0xe65   :  { %542 = vadd.xlane.f32.xlu1 %v541_v30 }
 0xed4   :  { %v511_v31 = vpop.xlane.xlu0 %510 }
 0xed5   :  { %v512_v32 = vsel %vm496_vm11, %v511_v31, %v490_v18 }
 0xed6   :  { %v531_v33 = vmul.f32 %v515_v14, %v512_v32 }
 0xed8   :  { %532 = vadd.xlane.f32.xlu0 %v531_v33  ;;  %v525_v34 = vpop.xlane.xlu0 %524  ;;  %v529_v35 = vpop.xlane.xlu1 %528 }
 0xed9   :  { %v526_v36 = vsel %vm518_vm12, %v525_v34, %v504_v22  ;;  %v530_v37 = vsel %vm518_vm12, %v529_v35, %v508_v23 }
 0xeda   :  { %v545_v39 = vmul.f32 %v537_v28, %v526_v36  ;;  %v549_v41 = vmul.f32 %v537_v28, %v530_v37 }
 0xedc   :  { %546 = vadd.xlane.f32.xlu0 %v545_v39  ;;  %550 = vadd.xlane.f32.xlu1 %v549_v41 }
 0xef2   :  { %v543_v43 = vpop.xlane.xlu1 %542 }
 0xef3   :  { %v544_v47 = vsel %vm540_vm13, %v543_v43, %v522_v29  ;;  %v624_v29 = vxor.u32 2147483648, %v623_v27 }
 0xef4   :  { %v563_v49 = vmul.f32 %v559_v45, %v544_v47 }
 0xef6   :  { %564 = vadd.xlane.f32.xlu1 %v563_v49 }
 0xf65   :  { %v533_v50 = vpop.xlane.xlu0 %532 }
 0xf66   :  { %v534_v51 = vsel %vm518_vm12, %v533_v50, %v512_v32 }
 0xf67   :  { %v553_v52 = vmul.f32 %v537_v28, %v534_v51 }
 0xf69   :  { %554 = vadd.xlane.f32.xlu0 %v553_v52  ;;  %v547_v54 = vpop.xlane.xlu0 %546  ;;  %v551_v56 = vpop.xlane.xlu1 %550 }
 0xf6a   :  { %v548_v2 = vsel %vm540_vm13, %v547_v54, %v526_v36  ;;  %v552_v48 = vsel %vm540_vm13, %v551_v56, %v530_v37 }
 0xf6b   :  { %v567_v57 = vmul.f32 %v559_v45, %v548_v2  ;;  %v571_v58 = vmul.f32 %v559_v45, %v552_v48 }
 0xf6d   :  { %568 = vadd.xlane.f32.xlu0 %v567_v57  ;;  %572 = vadd.xlane.f32.xlu1 %v571_v58 }
 0xf83   :  { %v565_v60 = vpop.xlane.xlu1 %564 }
 0xf84   :  { %v566_v62 = vsel %vm562_vm14, %v565_v60, %v544_v47 }
 0xf85   :  { %v585_v63 = vmul.f32 %v581_v61, %v566_v62 }
 0xf87   :  { %586 = vadd.xlane.f32.xlu1 %v585_v63 }
 0xff6   :  { %v555_v0 = vpop.xlane.xlu0 %554 }
 0xff7   :  { %v556_v3 = vsel %vm540_vm13, %v555_v0, %v534_v51 }
 0xff8   :  { %v575_v4 = vmul.f32 %v559_v45, %v556_v3 }
 0xffa   :  { %576 = vadd.xlane.f32.xlu0 %v575_v4  ;;  %v569_v5 = vpop.xlane.xlu0 %568  ;;  %v573_v6 = vpop.xlane.xlu1 %572 }
 0xffb   :  { %v570_v9 = vsel %vm562_vm14, %v569_v5, %v548_v2  ;;  %v574_v10 = vsel %vm562_vm14, %v573_v6, %v552_v48 }
 0xffc   :  { %v589_v11 = vmul.f32 %v581_v61, %v570_v9  ;;  %v593_v12 = vmul.f32 %v581_v61, %v574_v10 }
 0xffe   :  { %590 = vadd.xlane.f32.xlu0 %v589_v11  ;;  %594 = vadd.xlane.f32.xlu1 %v593_v12 }
0x1014   :  { %v587_v14 = vpop.xlane.xlu1 %586 }
0x1015   :  { %v588_v16 = vsel %vm584_vm15, %v587_v14, %v566_v62 }
0x1016   :  { %v607_v17 = vmul.f32 %v603_v15, %v588_v16 }
0x1018   :  { %608 = vadd.xlane.f32.xlu1 %v607_v17 }
0x1087   :  { %v577_v18 = vpop.xlane.xlu0 %576 }
0x1088   :  { %v578_v19 = vsel %vm562_vm14, %v577_v18, %v556_v3 }
0x1089   :  { %v597_v20 = vmul.f32 %v581_v61, %v578_v19 }
0x108b   :  { %598 = vadd.xlane.f32.xlu0 %v597_v20  ;;  %v591_v21 = vpop.xlane.xlu0 %590  ;;  %v595_v22 = vpop.xlane.xlu1 %594 }
0x108c   :  { %v592_v23 = vsel %vm584_vm15, %v591_v21, %v570_v9  ;;  %v596_v24 = vsel %vm584_vm15, %v595_v22, %v574_v10 }
0x108d   :  { %v611_v25 = vmul.f32 %v603_v15, %v592_v23  ;;  %v615_v26 = vmul.f32 %v603_v15, %v596_v24 }
0x108f   :  { %612 = vadd.xlane.f32.xlu0 %v611_v25  ;;  %616 = vadd.xlane.f32.xlu1 %v615_v26 }
0x10a5   :  { %v609_v28 = vpop.xlane.xlu1 %608 }
0x10a6   :  { %v610_v30 = vsel %vm606_vm1, %v609_v28, %v588_v16 }
0x10a7   :  { %v628_v31 = vmul.f32 %v624_v29, %v610_v30 }
0x10a9   :  { %629 = vadd.xlane.f32.xlu1 %v628_v31 }
0x1118   :  { %v599_v32 = vpop.xlane.xlu0 %598 }
0x1119   :  { %v600_v33 = vsel %vm584_vm15, %v599_v32, %v578_v19 }
0x111a   :  { %v619_v34 = vmul.f32 %v603_v15, %v600_v33 }
0x111c   :  { %620 = vadd.xlane.f32.xlu0 %v619_v34  ;;  %v613_v35 = vpop.xlane.xlu0 %612  ;;  %v617_v36 = vpop.xlane.xlu1 %616 }
0x111d   :  { %v614_v37 = vsel %vm606_vm1, %v613_v35, %v592_v23  ;;  %v618_v39 = vsel %vm606_vm1, %v617_v36, %v596_v24 }
0x111e   :  { %v632_v41 = vmul.f32 %v624_v29, %v614_v37  ;;  %v636_v42 = vmul.f32 %v624_v29, %v618_v39 }
0x1120   :  { %633 = vadd.xlane.f32.xlu0 %v632_v41  ;;  %637 = vadd.xlane.f32.xlu1 %v636_v42 }
0x1136   :  { %v630_v43 = vpop.xlane.xlu1 %629 }
0x1137   :  { %v631_v45 = vsel %vm627_vm2, %v630_v43, %v610_v30 }
0x1138   :  { %v645_v47 = vmul.f32 %v896_v40, %v631_v45 }
0x113a   :  { %v647_v49 = vsel %vm646_vm3, %v631_v45, %v645_v47 }
0x113b   :  { %701 = vst [vmem:[%s1004_s1] sm:$0xff] %v647_v49 }
0x11a9   :  { %v621_v50 = vpop.xlane.xlu0 %620 }
0x11aa   :  { %v622_v51 = vsel %vm606_vm1, %v621_v50, %v600_v33 }
0x11ab   :  { %v640_v52 = vmul.f32 %v624_v29, %v622_v51 }
0x11ad   :  { %641 = vadd.xlane.f32.xlu0 %v640_v52  ;;  %v634_v54 = vpop.xlane.xlu0 %633  ;;  %v638_v56 = vpop.xlane.xlu1 %637 }
0x11ae   :  { %v635_v2 = vsel %vm627_vm2, %v634_v54, %v614_v37  ;;  %v639_v40 = vsel %vm627_vm2, %v638_v56, %v618_v39 }
0x11af   :  { %v650_v38 = vmul.f32 %v824_v55, %v635_v2  ;;  %v656_v48 = vmul.f32 %v778_v46, %v639_v40 }
0x11b1   :  { %v652_v57 = vsel %vm651_vm5, %v635_v2, %v650_v38  ;;  %v658_v58 = vsel %vm657_vm4, %v639_v40, %v656_v48 }
0x11b2   :  { %703 = vst [vmem:[%s1004_s1 + $0x8] sm:$0xff] %v652_v57  ;;  %705 = vst [vmem:[%s1004_s1 + $0x10] sm:$0xff] %v658_v58 }
0x123a   :  { %v642_v59 = vpop.xlane.xlu0 %641 }
0x123b   :  { %v643_v55 = vsel %vm627_vm2, %v642_v59, %v622_v51 }
0x123c   :  { %v662_v46 = vmul.f32 %v757_v8, %v643_v55 }
0x123e   :  { %v664_v44 = vsel %vm663_vm6, %v643_v55, %v662_v46 }
0x123f   :  { %707 = vst [vmem:[%s1004_s1 + $0x18] sm:$0xff] %v664_v44 }

// kernel: implicit_nn_linear_forward.1
= control target key start
LH: loop header
LB: loop body
LE: loop exit
PB: predicated region body
PF: predicated region fallthrough
CT: control target
= control target key end

     0   :  { %12 = vsyncpa [#allocation3], 0  ;;  %v400_v2 = vmov 0.0|0.0   ;;  %vm401_vm0 = vmmov 0   ;;  %v402_v4 = vmov 0.0   ;;  %vm32_vm1 = vcmask 130048   ;;  %s513_s0 = inlined_call_operand.vmem [shape: f32[8,32], index: 0, kind: input, shape index: {}]   ;;  %s514_s1 = inlined_call_operand.vmem [shape: f32[8,16], index: 1, kind: input, shape index: {}]   ;;  %s515_s2 = inlined_call_operand.vmem [shape: f32[32,32], index: 2, kind: input, shape index: {}]   ;;  %s516_s3 = inlined_call_operand.vmem [shape: f32[16,32], index: 3, kind: input, shape index: {}]   ;;  %s517_s4 = inlined_call_operand.vmem [shape: f32[32,8], index: 4, kind: input, shape index: {}]   ;;  %s518_s5 = inlined_call_operand.hbm [shape: f32[8,32], index: 5, kind: output, shape index: {0}]   ;;  %s519_s6 = inlined_call_operand.hbm [shape: f32[8,8], index: 6, kind: output, shape index: {1}]  }
   0x1   :  { %v30_v0 = vld [vmem:[%s516_s3] sm:$0xff]  ;;  %v31_v1 = vld [vmem:[%s516_s3 + $0x8] sm:$0xff]  ;;  %330 = vmatprep.subr.bf16.mxu0 %v400_v2  ;;  %305 = vmatprep.mubr.msk.f32.mxu0 %vm401_vm0, %v402_v4  ;;  %v183_v12 = vld [vmem:[%s517_s4 + $0x10] sm:$0xff] }
   0x2   :  { %v331_v3 = vpack.c.bf16 %v31_v1, %v30_v0  ;;  %v25_v5 = vld [vmem:[%s515_s2] sm:$0xff]  ;;  %v26_v6 = vld [vmem:[%s515_s2 + $0x8] sm:$0xff]  ;;  %339 = vmatprep.subr.bf16.mxu1 %v400_v2  ;;  %327 = vmatprep.mubr.msk.f32.mxu1 %vm401_vm0, %v402_v4  ;;  %v184_v13 = vld [vmem:[%s517_s4 + $0x18] sm:$0xff] }
   0x3   :  { %v181_v7 = vld [vmem:[%s517_s4] sm:$0xff]  ;;  %v182_v8 = vld [vmem:[%s517_s4 + $0x8] sm:$0xff]  ;;  %v334_v10 = vpack.c.bf16 %v26_v6, %v25_v5  ;;  %v27_v14 = vld [vmem:[%s515_s2 + $0x10] sm:$0xff] }
   0x4   :  { %332 = vmatpush3.bf16.msra.mxu0 %v331_v3  ;;  %v29_v9 = vld [vmem:[%s514_s1] sm:$0xff]  ;;  %v340_v11 = vpack.c.bf16 %v182_v8, %v181_v7  ;;  %v28_v15 = vld [vmem:[%s515_s2 + $0x18] sm:$0xff] }
   0x5   :  { %333 = vmatprep.subr.bf16.mxu0 %v400_v2 }
   0x6   :  { %13 = vsyncpa [#allocation5], 0  ;;  %341 = vmatpush3.bf16.msra.mxu1 %v340_v11  ;;  %v343_v16 = vpack.c.bf16 %v184_v13, %v183_v12  ;;  %v337_v17 = vpack.c.bf16 %v28_v15, %v27_v14  ;;  %v24_v18 = vld [vmem:[%s513_s0] sm:$0xff]  ;;  %vm106_vm2 = vcmask 261120   ;;  %s403_s2 = smov [#allocation4]   ;;  %vm255_vm3 = vcmask 64512  }
   0x7   :  { %306 = vmatmul.mubr.msk.f32.vlgmr.msra.gmra.mrb[0].mxu0 %vm32_vm1, %v29_v9  ;;  %342 = vmatprep.subr.bf16.mxu1 %v400_v2  ;;  %s273_s18 = sshll.u32 %s403_s2, 4  ;;  %s404_s19 = smov [#allocation2]   ;;  %s274_s18 = int_to_ptr.vmem [resolvable:$true] %s273_s18 }
   0x8   :  { %335 = vmatpush3.bf16.msra.mxu0 %v334_v10  ;;  %316 = vmatprep.mubr.msk.f32.mxu0 %vm401_vm0, %v402_v4  ;;  %s263_s20 = sshll.u32 %s404_s19, 4  ;;  %s352_s21 = scalar_lea.vmem %s274_s18, 128  ;;  %s481_s20 = int_to_ptr.vmem [resolvable:$true] %s263_s20 }
   0x9   :  { %336 = vmatprep.subr.bf16.mxu0 %v400_v2  ;;  %p353_p0 = scmp.ne.s32.totalorder %s274_s18, %s352_s21  ;;  %p357_p1 = scmp.lt.s32.totalorder %s274_s18, %s274_s18 }
   0xa   :  { %344 = vmatpush3.bf16.msra.mxu1 %v343_v16  ;;  %p358_p2 = scmp.lt.s32.totalorder %s352_s21, %s352_s21 }
   0xc   :  { %338 = vmatpush3.bf16.msra.mxu0 %v337_v17  ;;  %p359_p3 = por %p358_p2, %p357_p1 }
   0xd   :  { %328 = vmatmul.mubr.msk.f32.vlgmr.msra.gmra.mrb[0].mxu1 %vm106_vm2, %v24_v18 }
   0xe   :  { %p360_p4 = pnand %p359_p3, %p353_p0 }
   0xf   :  { %317 = vmatmul.mubr.msk.f32.vlgmr.msra.gmra.mrb[0].mxu0 %vm106_vm2, %v24_v18 }
  0xe0   :  { %v251_v19 = vpop.f32.mrb[0].mxu1 }
  0xe1   :  { %256 = vst.msk [vmem:[#allocation4] sm:$0xff] %vm255_vm3, %v251_v19  ;;  %v329_v20 = vpop.f32.mrb[1].mxu1 }
  0xe2   :  { %v176_v21 = vpop.f32.mrb[0].mxu0 }
  0xe3   :  { %363 = shalt.err (!%p360_p4)
}
  0xe4   :  { %s364_s23 = scalar_lea.hbm %s519_s6, 128 }
  0xe5   :  { %p365_p5 = scmp.ne.s32.totalorder %s519_s6, %s364_s23  ;;  %p368_p6 = scmp.lt.u32.totalorder %s364_s23, %s519_s6 }
  0xe7   :  { %p370_p7 = pnand %p368_p6, %p365_p5 }
  0xe9   :  { %373 = shalt.err (!%p370_p7)
}
  0xea   :  { %276 = dma.vmem_to_hbm [thread:$0]  %s274_s18, 128, %s519_s6, [#allocation5]   ;;  %180 = vst.msk [vmem:[#allocation2] sm:$0xff] %vm106_vm2, %v176_v21  ;;  %v318_v22 = vpop.f32.mrb[1].mxu0 }
  0xeb   :  { %s374_s30 = scalar_lea.vmem %s481_s20, 128  ;;  %p379_p9 = scmp.lt.s32.totalorder %s481_s20, %s481_s20 }
  0xec   :  { %p375_p8 = scmp.ne.s32.totalorder %s481_s20, %s374_s30  ;;  %p380_p10 = scmp.lt.s32.totalorder %s374_s30, %s374_s30 }
  0xee   :  { %p381_p11 = por %p380_p10, %p379_p9 }
  0xf0   :  { %p382_p12 = pnand %p381_p11, %p375_p8 }
  0xf2   :  { %385 = shalt.err (!%p382_p12)
}
  0xf3   :  { %s386_s8 = scalar_lea.hbm %s518_s5, 128 }
  0xf4   :  { %p387_p13 = scmp.ne.s32.totalorder %s518_s5, %s386_s8  ;;  %p390_p0 = scmp.lt.u32.totalorder %s386_s8, %s518_s5 }
  0xf6   :  { %p392_p1 = pnand %p390_p0, %p387_p13 }
  0xf8   :  { %395 = shalt.err (!%p392_p1)
}
  0xf9   :  { %266 = dma.vmem_to_hbm [thread:$0]  %s481_s20, 128, %s518_s5, [#allocation3]  }
  0xfa   :  { %396 = dma.done.wait [#allocation3], 128  }
  0xfb   :  { %397 = vsyncadd [#allocation3], 4294967168 }
  0xfc   :  { %398 = dma.done.wait [#allocation5], 128  }
  0xfd   :  { %399 = vsyncadd [#allocation5], 4294967168 }
  0xfe   :  { %283 = vsyncpa [#allocation3], 1 }
  0xff   :  { %284 = vsyncpa [#allocation5], 1 }

</bundles_post_ra>
